<compile_context>
chip_gen: v7x
topology: tpu7x:2x2x1
jax: 0.10.0
libtpu: 0.0.40
codegen_flags: <defaults>
</compile_context>

<pallas_src>
import functools

import jax
import jax.numpy as jnp
from jax.experimental import pallas as pl
from jax.experimental.pallas import tpu as pltpu

_LN_EPS = 1e-5
_NEG_BIG = -1e30  # finite large negative instead of -inf (bf16/f32 safe)


# ----------------------- fused attention block kernel ------------------------

def _attn_block_kernel(x_ref, g_ref, b_ref,
                       wq_ref, bq_ref, wk_ref, bk_ref, wv_ref, bv_ref,
                       wo_ref, bo_ref, o_ref, *, n_heads, scale):
    """One batch element: x + MHA(LN1(x)), heads unrolled in-kernel."""
    x = x_ref[0].astype(jnp.float32)                             # (L, D)
    L = x.shape[0]

    # LayerNorm (f32 statistics).
    mean = jnp.mean(x, axis=-1, keepdims=True)
    var = jnp.mean(jnp.square(x - mean), axis=-1, keepdims=True)
    h = (x - mean) * jax.lax.rsqrt(var + _LN_EPS)
    h = h * g_ref[...] + b_ref[...]                              # (L, D) f32

    # Causal mask generated in-kernel (cheap VPU work, no mask DMA).
    row = jax.lax.broadcasted_iota(jnp.int32, (L, L), 0)
    col = jax.lax.broadcasted_iota(jnp.int32, (L, L), 1)
    mask = (col > row).astype(jnp.float32) * jnp.float32(_NEG_BIG)

    # Residual + out-proj bias accumulated once; per-head contributions added below.
    acc = x + bo_ref[...]
    for hd in range(n_heads):
        wq = wq_ref[hd]                                          # (D, Dh)
        wk = wk_ref[hd]
        wv = wv_ref[hd]
        hc = h.astype(wq.dtype)
        q = (jnp.dot(hc, wq, preferred_element_type=jnp.float32) + bq_ref[hd]) * scale
        k = jnp.dot(hc, wk, preferred_element_type=jnp.float32) + bk_ref[hd]
        v = jnp.dot(hc, wv, preferred_element_type=jnp.float32) + bv_ref[hd]
        # Contract q.k on the Dh axis directly (no materialized k.T).
        s = jax.lax.dot_general(q, k, (((1,), (1,)), ((), ())),
                                preferred_element_type=jnp.float32) + mask
        s = s - jnp.max(s, axis=-1, keepdims=True)
        p = jnp.exp(s)
        p = p * pl.reciprocal(jnp.sum(p, axis=-1, keepdims=True), approx=True)
        o_h = jnp.dot(p, v, preferred_element_type=jnp.float32)  # (L, Dh)
        acc = acc + jnp.dot(o_h.astype(wo_ref.dtype), wo_ref[hd],
                            preferred_element_type=jnp.float32)  # (L, D)
    o_ref[0] = acc.astype(o_ref.dtype)


def attn_block(x, blk, n_heads):
    B, L, D = x.shape
    Dh = D // n_heads
    kernel = functools.partial(_attn_block_kernel, n_heads=n_heads, scale=Dh ** -0.5)
    full2 = lambda b: (0, 0)
    full3 = lambda b: (0, 0, 0)
    return pl.pallas_call(
        kernel,
        out_shape=jax.ShapeDtypeStruct((B, L, D), x.dtype),
        grid=(B,),
        in_specs=[
            pl.BlockSpec((1, L, D), lambda b: (b, 0, 0)),
            pl.BlockSpec((1, D), full2),                  # ln1_g
            pl.BlockSpec((1, D), full2),                  # ln1_b
            pl.BlockSpec((n_heads, D, Dh), full3),        # wq
            pl.BlockSpec((n_heads, 1, Dh), full3),        # bq
            pl.BlockSpec((n_heads, D, Dh), full3),        # wk
            pl.BlockSpec((n_heads, 1, Dh), full3),        # bk
            pl.BlockSpec((n_heads, D, Dh), full3),        # wv
            pl.BlockSpec((n_heads, 1, Dh), full3),        # bv
            pl.BlockSpec((n_heads, Dh, D), full3),        # wo
            pl.BlockSpec((1, D), full2),                  # bo
        ],
        out_specs=pl.BlockSpec((1, L, D), lambda b: (b, 0, 0)),
        compiler_params=pltpu.CompilerParams(dimension_semantics=("parallel",)),
    )(x, blk["ln1_g"], blk["ln1_b"],
      blk["wq"], blk["bq"], blk["wk"], blk["bk"], blk["wv"], blk["bv"],
      blk["wo"], blk["bo"])


# -------------------------- fused MLP block kernel ----------------------------

def _mlp_block_kernel(x_ref, g_ref, b_ref, w1_ref, b1_ref, w2_ref, b2_ref, o_ref):
    """Row tile: x + proj(QuickGELU(fc(LN2(x))))."""
    x = x_ref[...].astype(jnp.float32)                           # (TM, D)
    mean = jnp.mean(x, axis=-1, keepdims=True)
    var = jnp.mean(jnp.square(x - mean), axis=-1, keepdims=True)
    h = (x - mean) * jax.lax.rsqrt(var + _LN_EPS)
    h = h * g_ref[...] + b_ref[...]
    h1 = jnp.dot(h.astype(w1_ref.dtype), w1_ref[...],
                 preferred_element_type=jnp.float32) + b1_ref[...]
    h1 = h1 * jax.nn.sigmoid(1.702 * h1)                         # QuickGELU (CLIP)
    out = jnp.dot(h1.astype(w2_ref.dtype), w2_ref[...],
                  preferred_element_type=jnp.float32) + b2_ref[...]
    o_ref[...] = (x + out).astype(o_ref.dtype)


def mlp_block(x2d, blk, tm=None):
    M, D = x2d.shape
    Hd = blk["fc_w"].shape[1]
    if tm is None:
        # Keep (TM, 4D) intermediate + double-buffered tiles + weights inside VMEM
        # (sized conservatively for v7x's 64 MiB physical VMEM).
        tm = M if M <= 256 else 256
    grid_m = pl.cdiv(M, tm)
    full = lambda i: (0, 0)
    return pl.pallas_call(
        _mlp_block_kernel,
        out_shape=jax.ShapeDtypeStruct((M, D), x2d.dtype),
        grid=(grid_m,),
        in_specs=[
            pl.BlockSpec((tm, D), lambda i: (i, 0)),
            pl.BlockSpec((1, D), full),                  # ln2_g
            pl.BlockSpec((1, D), full),                  # ln2_b
            pl.BlockSpec((D, Hd), full),                 # fc_w (VMEM-resident across tiles)
            pl.BlockSpec((1, Hd), full),                 # fc_b
            pl.BlockSpec((Hd, D), full),                 # proj_w
            pl.BlockSpec((1, D), full),                  # proj_b
        ],
        out_specs=pl.BlockSpec((tm, D), lambda i: (i, 0)),
        compiler_params=pltpu.CompilerParams(dimension_semantics=("parallel",)),
    )(x2d, blk["ln2_g"], blk["ln2_b"], blk["fc_w"], blk["fc_b"],
      blk["proj_w"], blk["proj_b"])


# --------------------- fused final LayerNorm + projection ---------------------

def _final_ln_proj_kernel(x_ref, g_ref, b_ref, w_ref, o_ref):
    x = x_ref[...].astype(jnp.float32)
    mean = jnp.mean(x, axis=-1, keepdims=True)
    var = jnp.mean(jnp.square(x - mean), axis=-1, keepdims=True)
    h = (x - mean) * jax.lax.rsqrt(var + _LN_EPS)
    h = h * g_ref[...] + b_ref[...]
    o_ref[...] = jnp.dot(h.astype(w_ref.dtype), w_ref[...],
                         preferred_element_type=jnp.float32).astype(o_ref.dtype)


def final_ln_project(sel, g, b, w):
    Bn, D = sel.shape
    E = w.shape[1]
    full = lambda i: (0, 0)
    return pl.pallas_call(
        _final_ln_proj_kernel,
        out_shape=jax.ShapeDtypeStruct((Bn, E), sel.dtype),
        grid=(1,),
        in_specs=[pl.BlockSpec((Bn, D), full),
                  pl.BlockSpec((1, D), full),
                  pl.BlockSpec((1, D), full),
                  pl.BlockSpec((D, E), full)],
        out_specs=pl.BlockSpec((Bn, E), full),
    )(sel, g, b, w)


# ------------------------------ model forward ---------------------------------

def text_encoder_forward(params, prompts, tokenized_prompts, compound_prompts_deeper_text,
                         *, n_heads, n_ctx):
    # prompts: (B, L, D) token embeddings (prefix | learned ctx | suffix)
    # Positional add left to XLA (single trivial elementwise pass).
    x = prompts + params["positional_embedding"][None].astype(prompts.dtype)
    counter = 0
    for li, blk in enumerate(params["blocks"]):
        # MaPLe deep-prompt injection on the text branch (skipped on the first layer):
        # replace tokens [1 : 1+n_ctx] along the sequence axis.
        if (li > 0 and len(compound_prompts_deeper_text) > 0
                and counter <= len(compound_prompts_deeper_text) - 1):
            ctx = compound_prompts_deeper_text[counter].astype(x.dtype)     # (n_ctx, D)
            ctx_b = jnp.broadcast_to(ctx[None], (x.shape[0],) + ctx.shape)
            x = jnp.concatenate([x[:, :1], ctx_b, x[:, 1 + n_ctx:]], axis=1)
            counter += 1
        B, L, D = x.shape
        x = attn_block(x, blk, n_heads)                                     # LN1+MHA+proj+res
        x = mlp_block(x.reshape(B * L, D), blk).reshape(B, L, D)            # LN2+MLP+res
    B, L, D = x.shape
    # EOT token (argmax of token ids) -> ln_final -> text_projection.
    # LayerNorm is row-wise, so gathering before ln_final is exactly equivalent.
    eot = jnp.argmax(tokenized_prompts, axis=-1)                            # (B,)
    sel = x[jnp.arange(B), eot]                                             # (B, D)
    return final_ln_project(sel, params["lnf_g"], params["lnf_b"],
                            params["text_projection"])                      # (B, E)


# --------------------------- deterministic init --------------------------------

def init_params(key, n_layers, L, D, E, n_heads):
    Dh = D // n_heads
    ks = list(jax.random.split(key, 2 + 6 * n_layers))

    def nrm(shape, scale=0.02):
        return (scale * jax.random.normal(ks.pop(), shape)).astype(jnp.float32)

    blocks = []
    for _ in range(n_layers):
        blocks.append(dict(
            ln1_g=jnp.ones((1, D), jnp.float32), ln1_b=jnp.zeros((1, D), jnp.float32),
            # per-head layout: torch in_proj_weight (3D, D) split into q/k/v and reshaped
            wq=nrm((n_heads, D, Dh)), bq=jnp.zeros((n_heads, 1, Dh), jnp.float32),
            wk=nrm((n_heads, D, Dh)), bk=jnp.zeros((n_heads, 1, Dh), jnp.float32),
            wv=nrm((n_heads, D, Dh)), bv=jnp.zeros((n_heads, 1, Dh), jnp.float32),
            wo=nrm((n_heads, Dh, D)), bo=jnp.zeros((1, D), jnp.float32),
            ln2_g=jnp.ones((1, D), jnp.float32), ln2_b=jnp.zeros((1, D), jnp.float32),
            fc_w=nrm((D, 4 * D)), fc_b=jnp.zeros((1, 4 * D), jnp.float32),
            proj_w=nrm((4 * D, D)), proj_b=jnp.zeros((1, D), jnp.float32),
        ))
    return dict(
        positional_embedding=nrm((L, D), scale=0.01),
        blocks=blocks,
        lnf_g=jnp.ones((1, D), jnp.float32), lnf_b=jnp.zeros((1, D), jnp.float32),
        text_projection=nrm((D, E)),
    )


# ----------------------------------- main --------------------------------------

if __name__ == "__main__":
    B, L, D, E = 2, 8, 32, 32           # n_cls (batch), seq, width, embed_dim
    n_heads, n_layers, n_ctx = 4, 3, 2  # heads, transformer layers, MaPLe ctx length

    root = jax.random.PRNGKey(0)
    k_par, k_prefix, k_suffix, k_ctx, k_cp, k_tok = jax.random.split(root, 6)

    params = init_params(k_par, n_layers, L, D, E, n_heads)

    # Prompt construction (MultiModalPromptLearner.construct_prompts):
    # prompts = concat([token_prefix, ctx (broadcast to n_cls), token_suffix], dim=1)
    prefix = 0.02 * jax.random.normal(k_prefix, (B, 1, D))
    suffix = 0.02 * jax.random.normal(k_suffix, (B, L - 1 - n_ctx, D))
    ctx = 0.02 * jax.random.normal(k_ctx, (n_ctx, D))
    prompts = jnp.concatenate(
        [prefix, jnp.broadcast_to(ctx[None], (B, n_ctx, D)), suffix], axis=1
    ).astype(jnp.float32)                                             # (B, L, D)

    # Compound prompts for deeper text layers: list of (n_ctx, D)
    cp_keys = jax.random.split(k_cp, n_layers - 1)
    compound_prompts_deeper_text = [
        (0.02 * jax.random.normal(k, (n_ctx, D))).astype(jnp.float32) for k in cp_keys
    ]

    # Tokenized prompts: ints with the EOT token (largest id) at a chosen position per row.
    tok = jax.random.randint(k_tok, (B, L), 1, 400)
    eot_pos = jnp.array([L - 2, L - 1], dtype=jnp.int32)
    tok = tok.at[jnp.arange(B), eot_pos].set(49407)

    fwd = jax.jit(functools.partial(text_encoder_forward, n_heads=n_heads, n_ctx=n_ctx))
    out = fwd(params, prompts, tok, compound_prompts_deeper_text)
    out = jax.block_until_ready(out)

    assert out.shape == (B, E), out.shape
    assert bool(jnp.all(jnp.isfinite(out)))
    print("KERNEL_OK")
</pallas_src>

<mosaic_0001>
module attributes {stable_mosaic.version = 11 : i64} {
  func.func @_attn_block_kernel(%arg0: i32, %arg1: memref<1x8x32xf32, #tpu.memory_space<vmem>>, %arg2: memref<1x32xf32, #tpu.memory_space<vmem>>, %arg3: memref<1x32xf32, #tpu.memory_space<vmem>>, %arg4: memref<4x32x8xf32, #tpu.memory_space<vmem>>, %arg5: memref<4x1x8xf32, #tpu.memory_space<vmem>>, %arg6: memref<4x32x8xf32, #tpu.memory_space<vmem>>, %arg7: memref<4x1x8xf32, #tpu.memory_space<vmem>>, %arg8: memref<4x32x8xf32, #tpu.memory_space<vmem>>, %arg9: memref<4x1x8xf32, #tpu.memory_space<vmem>>, %arg10: memref<4x8x32xf32, #tpu.memory_space<vmem>>, %arg11: memref<1x32xf32, #tpu.memory_space<vmem>>, %arg12: memref<1x8x32xf32, #tpu.memory_space<vmem>>) attributes {dimension_semantics = [#tpu.dimension_semantics<parallel>], iteration_bounds = array<i64: 2>, scalar_prefetch = 0 : i64, scratch_operands = 0 : i64, tpu.core_type = #tpu.core_type<tc>, window_params = [{transform_indices = @transform_0, window_bounds = array<i64: 1, 8, 32>}, {pipeline_mode = #tpu.pipeline_mode<synchronous>, transform_indices = @transform_1, window_bounds = array<i64: 1, 32>}, {pipeline_mode = #tpu.pipeline_mode<synchronous>, transform_indices = @transform_2, window_bounds = array<i64: 1, 32>}, {pipeline_mode = #tpu.pipeline_mode<synchronous>, transform_indices = @transform_3, window_bounds = array<i64: 4, 32, 8>}, {pipeline_mode = #tpu.pipeline_mode<synchronous>, transform_indices = @transform_4, window_bounds = array<i64: 4, 1, 8>}, {pipeline_mode = #tpu.pipeline_mode<synchronous>, transform_indices = @transform_5, window_bounds = array<i64: 4, 32, 8>}, {pipeline_mode = #tpu.pipeline_mode<synchronous>, transform_indices = @transform_6, window_bounds = array<i64: 4, 1, 8>}, {pipeline_mode = #tpu.pipeline_mode<synchronous>, transform_indices = @transform_7, window_bounds = array<i64: 4, 32, 8>}, {pipeline_mode = #tpu.pipeline_mode<synchronous>, transform_indices = @transform_8, window_bounds = array<i64: 4, 1, 8>}, {pipeline_mode = #tpu.pipeline_mode<synchronous>, transform_indices = @transform_9, window_bounds = array<i64: 4, 8, 32>}, {pipeline_mode = #tpu.pipeline_mode<synchronous>, transform_indices = @transform_10, window_bounds = array<i64: 1, 32>}, {transform_indices = @transform_11, window_bounds = array<i64: 1, 8, 32>}]} {
    %c0 = arith.constant 0 : index
    %c0_0 = arith.constant 0 : index
    %c0_1 = arith.constant 0 : index
    %0 = vector.load %arg1[%c0, %c0_0, %c0_1] : memref<1x8x32xf32, #tpu.memory_space<vmem>>, vector<1x8x32xf32>
    %1 = vector.shape_cast %0 : vector<1x8x32xf32> to vector<8x32xf32>
    %cst = arith.constant dense<0.000000e+00> : vector<8xf32>
    %2 = vector.multi_reduction <add>, %1, %cst [1] : vector<8x32xf32> to vector<8xf32>
    %3 = vector.shape_cast %2 : vector<8xf32> to vector<8x1xf32>
    %cst_2 = arith.constant 3.200000e+01 : f32
    %4 = vector.broadcast %cst_2 : f32 to vector<8x1xf32>
    %5 = arith.divf %3, %4 : vector<8x1xf32>
    %6 = vector.broadcast %5 : vector<8x1xf32> to vector<8x32xf32>
    %7 = arith.subf %1, %6 : vector<8x32xf32>
    %8 = arith.mulf %7, %7 : vector<8x32xf32>
    %cst_3 = arith.constant dense<0.000000e+00> : vector<8xf32>
    %9 = vector.multi_reduction <add>, %8, %cst_3 [1] : vector<8x32xf32> to vector<8xf32>
    %10 = vector.shape_cast %9 : vector<8xf32> to vector<8x1xf32>
    %cst_4 = arith.constant 3.200000e+01 : f32
    %11 = vector.broadcast %cst_4 : f32 to vector<8x1xf32>
    %12 = arith.divf %10, %11 : vector<8x1xf32>
    %13 = vector.broadcast %5 : vector<8x1xf32> to vector<8x32xf32>
    %14 = arith.subf %1, %13 : vector<8x32xf32>
    %cst_5 = arith.constant 9.99999974E-6 : f32
    %15 = vector.broadcast %cst_5 : f32 to vector<8x1xf32>
    %16 = arith.addf %12, %15 : vector<8x1xf32>
    %17 = math.rsqrt %16 : vector<8x1xf32>
    %18 = vector.broadcast %17 : vector<8x1xf32> to vector<8x32xf32>
    %19 = arith.mulf %14, %18 : vector<8x32xf32>
    %c0_6 = arith.constant 0 : index
    %c0_7 = arith.constant 0 : index
    %20 = vector.load %arg2[%c0_6, %c0_7] : memref<1x32xf32, #tpu.memory_space<vmem>>, vector<1x32xf32>
    %21 = vector.broadcast %20 : vector<1x32xf32> to vector<8x32xf32>
    %22 = arith.mulf %19, %21 : vector<8x32xf32>
    %c0_8 = arith.constant 0 : index
    %c0_9 = arith.constant 0 : index
    %23 = vector.load %arg3[%c0_8, %c0_9] : memref<1x32xf32, #tpu.memory_space<vmem>>, vector<1x32xf32>
    %24 = vector.broadcast %23 : vector<1x32xf32> to vector<8x32xf32>
    %25 = arith.addf %22, %24 : vector<8x32xf32>
    %26 = tpu.iota {dimensions = array<i32: 0>} : vector<8x8xi32>
    %27 = tpu.iota {dimensions = array<i32: 1>} : vector<8x8xi32>
    %28 = arith.cmpi sgt, %27, %26 : vector<8x8xi32>
    %29 = arith.extui %28 : vector<8x8xi1> to vector<8x8xi32>
    %30 = arith.sitofp %29 : vector<8x8xi32> to vector<8x8xf32>
    %cst_10 = arith.constant -1.000000e+30 : f32
    %31 = vector.broadcast %cst_10 : f32 to vector<8x8xf32>
    %32 = arith.mulf %30, %31 : vector<8x8xf32>
    %c0_11 = arith.constant 0 : index
    %c0_12 = arith.constant 0 : index
    %33 = vector.load %arg11[%c0_11, %c0_12] : memref<1x32xf32, #tpu.memory_space<vmem>>, vector<1x32xf32>
    %34 = vector.broadcast %33 : vector<1x32xf32> to vector<8x32xf32>
    %35 = arith.addf %1, %34 : vector<8x32xf32>
    %c0_13 = arith.constant 0 : index
    %c0_14 = arith.constant 0 : index
    %c0_15 = arith.constant 0 : index
    %36 = vector.load %arg4[%c0_13, %c0_14, %c0_15] : memref<4x32x8xf32, #tpu.memory_space<vmem>>, vector<1x32x8xf32>
    %37 = vector.shape_cast %36 : vector<1x32x8xf32> to vector<32x8xf32>
    %c0_16 = arith.constant 0 : index
    %c0_17 = arith.constant 0 : index
    %c0_18 = arith.constant 0 : index
    %38 = vector.load %arg6[%c0_16, %c0_17, %c0_18] : memref<4x32x8xf32, #tpu.memory_space<vmem>>, vector<1x32x8xf32>
    %39 = vector.shape_cast %38 : vector<1x32x8xf32> to vector<32x8xf32>
    %c0_19 = arith.constant 0 : index
    %c0_20 = arith.constant 0 : index
    %c0_21 = arith.constant 0 : index
    %40 = vector.load %arg8[%c0_19, %c0_20, %c0_21] : memref<4x32x8xf32, #tpu.memory_space<vmem>>, vector<1x32x8xf32>
    %41 = vector.shape_cast %40 : vector<1x32x8xf32> to vector<32x8xf32>
    %cst_22 = arith.constant dense<0.000000e+00> : vector<8x8xf32>
    %42 = tpu.matmul %25, %37, %cst_22 {dimension_numbers = #tpu.dot_dimension_numbers<[1], [0], [0], [1], [0, 0, 1, 1], [], []>} : vector<8x32xf32>, vector<32x8xf32>, vector<8x8xf32> -> vector<8x8xf32>
    %c0_23 = arith.constant 0 : index
    %c0_24 = arith.constant 0 : index
    %c0_25 = arith.constant 0 : index
    %43 = vector.load %arg5[%c0_23, %c0_24, %c0_25] : memref<4x1x8xf32, #tpu.memory_space<vmem>>, vector<1x1x8xf32>
    %44 = vector.shape_cast %43 : vector<1x1x8xf32> to vector<1x8xf32>
    %45 = vector.broadcast %44 : vector<1x8xf32> to vector<8x8xf32>
    %46 = arith.addf %42, %45 : vector<8x8xf32>
    %cst_26 = arith.constant 0.353553385 : f32
    %47 = vector.broadcast %cst_26 : f32 to vector<8x8xf32>
    %48 = arith.mulf %46, %47 : vector<8x8xf32>
    %cst_27 = arith.constant dense<0.000000e+00> : vector<8x8xf32>
    %49 = tpu.matmul %25, %39, %cst_27 {dimension_numbers = #tpu.dot_dimension_numbers<[1], [0], [0], [1], [0, 0, 1, 1], [], []>} : vector<8x32xf32>, vector<32x8xf32>, vector<8x8xf32> -> vector<8x8xf32>
    %c0_28 = arith.constant 0 : index
    %c0_29 = arith.constant 0 : index
    %c0_30 = arith.constant 0 : index
    %50 = vector.load %arg7[%c0_28, %c0_29, %c0_30] : memref<4x1x8xf32, #tpu.memory_space<vmem>>, vector<1x1x8xf32>
    %51 = vector.shape_cast %50 : vector<1x1x8xf32> to vector<1x8xf32>
    %52 = vector.broadcast %51 : vector<1x8xf32> to vector<8x8xf32>
    %53 = arith.addf %49, %52 : vector<8x8xf32>
    %cst_31 = arith.constant dense<0.000000e+00> : vector<8x8xf32>
    %54 = tpu.matmul %25, %41, %cst_31 {dimension_numbers = #tpu.dot_dimension_numbers<[1], [0], [0], [1], [0, 0, 1, 1], [], []>} : vector<8x32xf32>, vector<32x8xf32>, vector<8x8xf32> -> vector<8x8xf32>
    %c0_32 = arith.constant 0 : index
    %c0_33 = arith.constant 0 : index
    %c0_34 = arith.constant 0 : index
    %55 = vector.load %arg9[%c0_32, %c0_33, %c0_34] : memref<4x1x8xf32, #tpu.memory_space<vmem>>, vector<1x1x8xf32>
    %56 = vector.shape_cast %55 : vector<1x1x8xf32> to vector<1x8xf32>
    %57 = vector.broadcast %56 : vector<1x8xf32> to vector<8x8xf32>
    %58 = arith.addf %54, %57 : vector<8x8xf32>
    %cst_35 = arith.constant dense<0.000000e+00> : vector<8x8xf32>
    %59 = tpu.matmul %48, %53, %cst_35 {dimension_numbers = #tpu.dot_dimension_numbers<[1], [1], [0], [0], [0, 0, 1, 0], [], []>} : vector<8x8xf32>, vector<8x8xf32>, vector<8x8xf32> -> vector<8x8xf32>
    %60 = arith.addf %59, %32 : vector<8x8xf32>
    %cst_36 = arith.constant dense<0xFF800000> : vector<8xf32>
    %61 = vector.multi_reduction <maximumf>, %60, %cst_36 [1] : vector<8x8xf32> to vector<8xf32>
    %62 = vector.shape_cast %61 : vector<8xf32> to vector<8x1xf32>
    %63 = vector.broadcast %62 : vector<8x1xf32> to vector<8x8xf32>
    %64 = arith.subf %60, %63 : vector<8x8xf32>
    %65 = math.exp %64 : vector<8x8xf32>
    %cst_37 = arith.constant dense<0.000000e+00> : vector<8xf32>
    %66 = vector.multi_reduction <add>, %65, %cst_37 [1] : vector<8x8xf32> to vector<8xf32>
    %67 = vector.shape_cast %66 : vector<8xf32> to vector<8x1xf32>
    %68 = tpu.reciprocal %67 {approx = true} : vector<8x1xf32> -> vector<8x1xf32>
    %69 = vector.broadcast %68 : vector<8x1xf32> to vector<8x8xf32>
    %70 = arith.mulf %65, %69 : vector<8x8xf32>
    %cst_38 = arith.constant dense<0.000000e+00> : vector<8x8xf32>
    %71 = tpu.matmul %70, %58, %cst_38 {dimension_numbers = #tpu.dot_dimension_numbers<[1], [0], [0], [1], [0, 0, 1, 1], [], []>} : vector<8x8xf32>, vector<8x8xf32>, vector<8x8xf32> -> vector<8x8xf32>
    %c0_39 = arith.constant 0 : index
    %c0_40 = arith.constant 0 : index
    %c0_41 = arith.constant 0 : index
    %72 = vector.load %arg10[%c0_39, %c0_40, %c0_41] : memref<4x8x32xf32, #tpu.memory_space<vmem>>, vector<1x8x32xf32>
    %73 = vector.shape_cast %72 : vector<1x8x32xf32> to vector<8x32xf32>
    %cst_42 = arith.constant dense<0.000000e+00> : vector<8x32xf32>
    %74 = tpu.matmul %71, %73, %cst_42 {dimension_numbers = #tpu.dot_dimension_numbers<[1], [0], [0], [1], [0, 0, 1, 1], [], []>} : vector<8x8xf32>, vector<8x32xf32>, vector<8x32xf32> -> vector<8x32xf32>
    %75 = arith.addf %35, %74 : vector<8x32xf32>
    %c1 = arith.constant 1 : index
    %c0_43 = arith.constant 0 : index
    %c0_44 = arith.constant 0 : index
    %76 = vector.load %arg4[%c1, %c0_43, %c0_44] : memref<4x32x8xf32, #tpu.memory_space<vmem>>, vector<1x32x8xf32>
    %77 = vector.shape_cast %76 : vector<1x32x8xf32> to vector<32x8xf32>
    %c1_45 = arith.constant 1 : index
    %c0_46 = arith.constant 0 : index
    %c0_47 = arith.constant 0 : index
    %78 = vector.load %arg6[%c1_45, %c0_46, %c0_47] : memref<4x32x8xf32, #tpu.memory_space<vmem>>, vector<1x32x8xf32>
    %79 = vector.shape_cast %78 : vector<1x32x8xf32> to vector<32x8xf32>
    %c1_48 = arith.constant 1 : index
    %c0_49 = arith.constant 0 : index
    %c0_50 = arith.constant 0 : index
    %80 = vector.load %arg8[%c1_48, %c0_49, %c0_50] : memref<4x32x8xf32, #tpu.memory_space<vmem>>, vector<1x32x8xf32>
    %81 = vector.shape_cast %80 : vector<1x32x8xf32> to vector<32x8xf32>
    %cst_51 = arith.constant dense<0.000000e+00> : vector<8x8xf32>
    %82 = tpu.matmul %25, %77, %cst_51 {dimension_numbers = #tpu.dot_dimension_numbers<[1], [0], [0], [1], [0, 0, 1, 1], [], []>} : vector<8x32xf32>, vector<32x8xf32>, vector<8x8xf32> -> vector<8x8xf32>
    %c1_52 = arith.constant 1 : index
    %c0_53 = arith.constant 0 : index
    %c0_54 = arith.constant 0 : index
    %83 = vector.load %arg5[%c1_52, %c0_53, %c0_54] : memref<4x1x8xf32, #tpu.memory_space<vmem>>, vector<1x1x8xf32>
    %84 = vector.shape_cast %83 : vector<1x1x8xf32> to vector<1x8xf32>
    %85 = vector.broadcast %84 : vector<1x8xf32> to vector<8x8xf32>
    %86 = arith.addf %82, %85 : vector<8x8xf32>
    %cst_55 = arith.constant 0.353553385 : f32
    %87 = vector.broadcast %cst_55 : f32 to vector<8x8xf32>
    %88 = arith.mulf %86, %87 : vector<8x8xf32>
    %cst_56 = arith.constant dense<0.000000e+00> : vector<8x8xf32>
    %89 = tpu.matmul %25, %79, %cst_56 {dimension_numbers = #tpu.dot_dimension_numbers<[1], [0], [0], [1], [0, 0, 1, 1], [], []>} : vector<8x32xf32>, vector<32x8xf32>, vector<8x8xf32> -> vector<8x8xf32>
    %c1_57 = arith.constant 1 : index
    %c0_58 = arith.constant 0 : index
    %c0_59 = arith.constant 0 : index
    %90 = vector.load %arg7[%c1_57, %c0_58, %c0_59] : memref<4x1x8xf32, #tpu.memory_space<vmem>>, vector<1x1x8xf32>
    %91 = vector.shape_cast %90 : vector<1x1x8xf32> to vector<1x8xf32>
    %92 = vector.broadcast %91 : vector<1x8xf32> to vector<8x8xf32>
    %93 = arith.addf %89, %92 : vector<8x8xf32>
    %cst_60 = arith.constant dense<0.000000e+00> : vector<8x8xf32>
    %94 = tpu.matmul %25, %81, %cst_60 {dimension_numbers = #tpu.dot_dimension_numbers<[1], [0], [0], [1], [0, 0, 1, 1], [], []>} : vector<8x32xf32>, vector<32x8xf32>, vector<8x8xf32> -> vector<8x8xf32>
    %c1_61 = arith.constant 1 : index
    %c0_62 = arith.constant 0 : index
    %c0_63 = arith.constant 0 : index
    %95 = vector.load %arg9[%c1_61, %c0_62, %c0_63] : memref<4x1x8xf32, #tpu.memory_space<vmem>>, vector<1x1x8xf32>
    %96 = vector.shape_cast %95 : vector<1x1x8xf32> to vector<1x8xf32>
    %97 = vector.broadcast %96 : vector<1x8xf32> to vector<8x8xf32>
    %98 = arith.addf %94, %97 : vector<8x8xf32>
    %cst_64 = arith.constant dense<0.000000e+00> : vector<8x8xf32>
    %99 = tpu.matmul %88, %93, %cst_64 {dimension_numbers = #tpu.dot_dimension_numbers<[1], [1], [0], [0], [0, 0, 1, 0], [], []>} : vector<8x8xf32>, vector<8x8xf32>, vector<8x8xf32> -> vector<8x8xf32>
    %100 = arith.addf %99, %32 : vector<8x8xf32>
    %cst_65 = arith.constant dense<0xFF800000> : vector<8xf32>
    %101 = vector.multi_reduction <maximumf>, %100, %cst_65 [1] : vector<8x8xf32> to vector<8xf32>
    %102 = vector.shape_cast %101 : vector<8xf32> to vector<8x1xf32>
    %103 = vector.broadcast %102 : vector<8x1xf32> to vector<8x8xf32>
    %104 = arith.subf %100, %103 : vector<8x8xf32>
    %105 = math.exp %104 : vector<8x8xf32>
    %cst_66 = arith.constant dense<0.000000e+00> : vector<8xf32>
    %106 = vector.multi_reduction <add>, %105, %cst_66 [1] : vector<8x8xf32> to vector<8xf32>
    %107 = vector.shape_cast %106 : vector<8xf32> to vector<8x1xf32>
    %108 = tpu.reciprocal %107 {approx = true} : vector<8x1xf32> -> vector<8x1xf32>
    %109 = vector.broadcast %108 : vector<8x1xf32> to vector<8x8xf32>
    %110 = arith.mulf %105, %109 : vector<8x8xf32>
    %cst_67 = arith.constant dense<0.000000e+00> : vector<8x8xf32>
    %111 = tpu.matmul %110, %98, %cst_67 {dimension_numbers = #tpu.dot_dimension_numbers<[1], [0], [0], [1], [0, 0, 1, 1], [], []>} : vector<8x8xf32>, vector<8x8xf32>, vector<8x8xf32> -> vector<8x8xf32>
    %c1_68 = arith.constant 1 : index
    %c0_69 = arith.constant 0 : index
    %c0_70 = arith.constant 0 : index
    %112 = vector.load %arg10[%c1_68, %c0_69, %c0_70] : memref<4x8x32xf32, #tpu.memory_space<vmem>>, vector<1x8x32xf32>
    %113 = vector.shape_cast %112 : vector<1x8x32xf32> to vector<8x32xf32>
    %cst_71 = arith.constant dense<0.000000e+00> : vector<8x32xf32>
    %114 = tpu.matmul %111, %113, %cst_71 {dimension_numbers = #tpu.dot_dimension_numbers<[1], [0], [0], [1], [0, 0, 1, 1], [], []>} : vector<8x8xf32>, vector<8x32xf32>, vector<8x32xf32> -> vector<8x32xf32>
    %115 = arith.addf %75, %114 : vector<8x32xf32>
    %c2 = arith.constant 2 : index
    %c0_72 = arith.constant 0 : index
    %c0_73 = arith.constant 0 : index
    %116 = vector.load %arg4[%c2, %c0_72, %c0_73] : memref<4x32x8xf32, #tpu.memory_space<vmem>>, vector<1x32x8xf32>
    %117 = vector.shape_cast %116 : vector<1x32x8xf32> to vector<32x8xf32>
    %c2_74 = arith.constant 2 : index
    %c0_75 = arith.constant 0 : index
    %c0_76 = arith.constant 0 : index
    %118 = vector.load %arg6[%c2_74, %c0_75, %c0_76] : memref<4x32x8xf32, #tpu.memory_space<vmem>>, vector<1x32x8xf32>
    %119 = vector.shape_cast %118 : vector<1x32x8xf32> to vector<32x8xf32>
    %c2_77 = arith.constant 2 : index
    %c0_78 = arith.constant 0 : index
    %c0_79 = arith.constant 0 : index
    %120 = vector.load %arg8[%c2_77, %c0_78, %c0_79] : memref<4x32x8xf32, #tpu.memory_space<vmem>>, vector<1x32x8xf32>
    %121 = vector.shape_cast %120 : vector<1x32x8xf32> to vector<32x8xf32>
    %cst_80 = arith.constant dense<0.000000e+00> : vector<8x8xf32>
    %122 = tpu.matmul %25, %117, %cst_80 {dimension_numbers = #tpu.dot_dimension_numbers<[1], [0], [0], [1], [0, 0, 1, 1], [], []>} : vector<8x32xf32>, vector<32x8xf32>, vector<8x8xf32> -> vector<8x8xf32>
    %c2_81 = arith.constant 2 : index
    %c0_82 = arith.constant 0 : index
    %c0_83 = arith.constant 0 : index
    %123 = vector.load %arg5[%c2_81, %c0_82, %c0_83] : memref<4x1x8xf32, #tpu.memory_space<vmem>>, vector<1x1x8xf32>
    %124 = vector.shape_cast %123 : vector<1x1x8xf32> to vector<1x8xf32>
    %125 = vector.broadcast %124 : vector<1x8xf32> to vector<8x8xf32>
    %126 = arith.addf %122, %125 : vector<8x8xf32>
    %cst_84 = arith.constant 0.353553385 : f32
    %127 = vector.broadcast %cst_84 : f32 to vector<8x8xf32>
    %128 = arith.mulf %126, %127 : vector<8x8xf32>
    %cst_85 = arith.constant dense<0.000000e+00> : vector<8x8xf32>
    %129 = tpu.matmul %25, %119, %cst_85 {dimension_numbers = #tpu.dot_dimension_numbers<[1], [0], [0], [1], [0, 0, 1, 1], [], []>} : vector<8x32xf32>, vector<32x8xf32>, vector<8x8xf32> -> vector<8x8xf32>
    %c2_86 = arith.constant 2 : index
    %c0_87 = arith.constant 0 : index
    %c0_88 = arith.constant 0 : index
    %130 = vector.load %arg7[%c2_86, %c0_87, %c0_88] : memref<4x1x8xf32, #tpu.memory_space<vmem>>, vector<1x1x8xf32>
    %131 = vector.shape_cast %130 : vector<1x1x8xf32> to vector<1x8xf32>
    %132 = vector.broadcast %131 : vector<1x8xf32> to vector<8x8xf32>
    %133 = arith.addf %129, %132 : vector<8x8xf32>
    %cst_89 = arith.constant dense<0.000000e+00> : vector<8x8xf32>
    %134 = tpu.matmul %25, %121, %cst_89 {dimension_numbers = #tpu.dot_dimension_numbers<[1], [0], [0], [1], [0, 0, 1, 1], [], []>} : vector<8x32xf32>, vector<32x8xf32>, vector<8x8xf32> -> vector<8x8xf32>
    %c2_90 = arith.constant 2 : index
    %c0_91 = arith.constant 0 : index
    %c0_92 = arith.constant 0 : index
    %135 = vector.load %arg9[%c2_90, %c0_91, %c0_92] : memref<4x1x8xf32, #tpu.memory_space<vmem>>, vector<1x1x8xf32>
    %136 = vector.shape_cast %135 : vector<1x1x8xf32> to vector<1x8xf32>
    %137 = vector.broadcast %136 : vector<1x8xf32> to vector<8x8xf32>
    %138 = arith.addf %134, %137 : vector<8x8xf32>
    %cst_93 = arith.constant dense<0.000000e+00> : vector<8x8xf32>
    %139 = tpu.matmul %128, %133, %cst_93 {dimension_numbers = #tpu.dot_dimension_numbers<[1], [1], [0], [0], [0, 0, 1, 0], [], []>} : vector<8x8xf32>, vector<8x8xf32>, vector<8x8xf32> -> vector<8x8xf32>
    %140 = arith.addf %139, %32 : vector<8x8xf32>
    %cst_94 = arith.constant dense<0xFF800000> : vector<8xf32>
    %141 = vector.multi_reduction <maximumf>, %140, %cst_94 [1] : vector<8x8xf32> to vector<8xf32>
    %142 = vector.shape_cast %141 : vector<8xf32> to vector<8x1xf32>
    %143 = vector.broadcast %142 : vector<8x1xf32> to vector<8x8xf32>
    %144 = arith.subf %140, %143 : vector<8x8xf32>
    %145 = math.exp %144 : vector<8x8xf32>
    %cst_95 = arith.constant dense<0.000000e+00> : vector<8xf32>
    %146 = vector.multi_reduction <add>, %145, %cst_95 [1] : vector<8x8xf32> to vector<8xf32>
    %147 = vector.shape_cast %146 : vector<8xf32> to vector<8x1xf32>
    %148 = tpu.reciprocal %147 {approx = true} : vector<8x1xf32> -> vector<8x1xf32>
    %149 = vector.broadcast %148 : vector<8x1xf32> to vector<8x8xf32>
    %150 = arith.mulf %145, %149 : vector<8x8xf32>
    %cst_96 = arith.constant dense<0.000000e+00> : vector<8x8xf32>
    %151 = tpu.matmul %150, %138, %cst_96 {dimension_numbers = #tpu.dot_dimension_numbers<[1], [0], [0], [1], [0, 0, 1, 1], [], []>} : vector<8x8xf32>, vector<8x8xf32>, vector<8x8xf32> -> vector<8x8xf32>
    %c2_97 = arith.constant 2 : index
    %c0_98 = arith.constant 0 : index
    %c0_99 = arith.constant 0 : index
    %152 = vector.load %arg10[%c2_97, %c0_98, %c0_99] : memref<4x8x32xf32, #tpu.memory_space<vmem>>, vector<1x8x32xf32>
    %153 = vector.shape_cast %152 : vector<1x8x32xf32> to vector<8x32xf32>
    %cst_100 = arith.constant dense<0.000000e+00> : vector<8x32xf32>
    %154 = tpu.matmul %151, %153, %cst_100 {dimension_numbers = #tpu.dot_dimension_numbers<[1], [0], [0], [1], [0, 0, 1, 1], [], []>} : vector<8x8xf32>, vector<8x32xf32>, vector<8x32xf32> -> vector<8x32xf32>
    %155 = arith.addf %115, %154 : vector<8x32xf32>
    %c3 = arith.constant 3 : index
    %c0_101 = arith.constant 0 : index
    %c0_102 = arith.constant 0 : index
    %156 = vector.load %arg4[%c3, %c0_101, %c0_102] : memref<4x32x8xf32, #tpu.memory_space<vmem>>, vector<1x32x8xf32>
    %157 = vector.shape_cast %156 : vector<1x32x8xf32> to vector<32x8xf32>
    %c3_103 = arith.constant 3 : index
    %c0_104 = arith.constant 0 : index
    %c0_105 = arith.constant 0 : index
    %158 = vector.load %arg6[%c3_103, %c0_104, %c0_105] : memref<4x32x8xf32, #tpu.memory_space<vmem>>, vector<1x32x8xf32>
    %159 = vector.shape_cast %158 : vector<1x32x8xf32> to vector<32x8xf32>
    %c3_106 = arith.constant 3 : index
    %c0_107 = arith.constant 0 : index
    %c0_108 = arith.constant 0 : index
    %160 = vector.load %arg8[%c3_106, %c0_107, %c0_108] : memref<4x32x8xf32, #tpu.memory_space<vmem>>, vector<1x32x8xf32>
    %161 = vector.shape_cast %160 : vector<1x32x8xf32> to vector<32x8xf32>
    %cst_109 = arith.constant dense<0.000000e+00> : vector<8x8xf32>
    %162 = tpu.matmul %25, %157, %cst_109 {dimension_numbers = #tpu.dot_dimension_numbers<[1], [0], [0], [1], [0, 0, 1, 1], [], []>} : vector<8x32xf32>, vector<32x8xf32>, vector<8x8xf32> -> vector<8x8xf32>
    %c3_110 = arith.constant 3 : index
    %c0_111 = arith.constant 0 : index
    %c0_112 = arith.constant 0 : index
    %163 = vector.load %arg5[%c3_110, %c0_111, %c0_112] : memref<4x1x8xf32, #tpu.memory_space<vmem>>, vector<1x1x8xf32>
    %164 = vector.shape_cast %163 : vector<1x1x8xf32> to vector<1x8xf32>
    %165 = vector.broadcast %164 : vector<1x8xf32> to vector<8x8xf32>
    %166 = arith.addf %162, %165 : vector<8x8xf32>
    %cst_113 = arith.constant 0.353553385 : f32
    %167 = vector.broadcast %cst_113 : f32 to vector<8x8xf32>
    %168 = arith.mulf %166, %167 : vector<8x8xf32>
    %cst_114 = arith.constant dense<0.000000e+00> : vector<8x8xf32>
    %169 = tpu.matmul %25, %159, %cst_114 {dimension_numbers = #tpu.dot_dimension_numbers<[1], [0], [0], [1], [0, 0, 1, 1], [], []>} : vector<8x32xf32>, vector<32x8xf32>, vector<8x8xf32> -> vector<8x8xf32>
    %c3_115 = arith.constant 3 : index
    %c0_116 = arith.constant 0 : index
    %c0_117 = arith.constant 0 : index
    %170 = vector.load %arg7[%c3_115, %c0_116, %c0_117] : memref<4x1x8xf32, #tpu.memory_space<vmem>>, vector<1x1x8xf32>
    %171 = vector.shape_cast %170 : vector<1x1x8xf32> to vector<1x8xf32>
    %172 = vector.broadcast %171 : vector<1x8xf32> to vector<8x8xf32>
    %173 = arith.addf %169, %172 : vector<8x8xf32>
    %cst_118 = arith.constant dense<0.000000e+00> : vector<8x8xf32>
    %174 = tpu.matmul %25, %161, %cst_118 {dimension_numbers = #tpu.dot_dimension_numbers<[1], [0], [0], [1], [0, 0, 1, 1], [], []>} : vector<8x32xf32>, vector<32x8xf32>, vector<8x8xf32> -> vector<8x8xf32>
    %c3_119 = arith.constant 3 : index
    %c0_120 = arith.constant 0 : index
    %c0_121 = arith.constant 0 : index
    %175 = vector.load %arg9[%c3_119, %c0_120, %c0_121] : memref<4x1x8xf32, #tpu.memory_space<vmem>>, vector<1x1x8xf32>
    %176 = vector.shape_cast %175 : vector<1x1x8xf32> to vector<1x8xf32>
    %177 = vector.broadcast %176 : vector<1x8xf32> to vector<8x8xf32>
    %178 = arith.addf %174, %177 : vector<8x8xf32>
    %cst_122 = arith.constant dense<0.000000e+00> : vector<8x8xf32>
    %179 = tpu.matmul %168, %173, %cst_122 {dimension_numbers = #tpu.dot_dimension_numbers<[1], [1], [0], [0], [0, 0, 1, 0], [], []>} : vector<8x8xf32>, vector<8x8xf32>, vector<8x8xf32> -> vector<8x8xf32>
    %180 = arith.addf %179, %32 : vector<8x8xf32>
    %cst_123 = arith.constant dense<0xFF800000> : vector<8xf32>
    %181 = vector.multi_reduction <maximumf>, %180, %cst_123 [1] : vector<8x8xf32> to vector<8xf32>
    %182 = vector.shape_cast %181 : vector<8xf32> to vector<8x1xf32>
    %183 = vector.broadcast %182 : vector<8x1xf32> to vector<8x8xf32>
    %184 = arith.subf %180, %183 : vector<8x8xf32>
    %185 = math.exp %184 : vector<8x8xf32>
    %cst_124 = arith.constant dense<0.000000e+00> : vector<8xf32>
    %186 = vector.multi_reduction <add>, %185, %cst_124 [1] : vector<8x8xf32> to vector<8xf32>
    %187 = vector.shape_cast %186 : vector<8xf32> to vector<8x1xf32>
    %188 = tpu.reciprocal %187 {approx = true} : vector<8x1xf32> -> vector<8x1xf32>
    %189 = vector.broadcast %188 : vector<8x1xf32> to vector<8x8xf32>
    %190 = arith.mulf %185, %189 : vector<8x8xf32>
    %cst_125 = arith.constant dense<0.000000e+00> : vector<8x8xf32>
    %191 = tpu.matmul %190, %178, %cst_125 {dimension_numbers = #tpu.dot_dimension_numbers<[1], [0], [0], [1], [0, 0, 1, 1], [], []>} : vector<8x8xf32>, vector<8x8xf32>, vector<8x8xf32> -> vector<8x8xf32>
    %c3_126 = arith.constant 3 : index
    %c0_127 = arith.constant 0 : index
    %c0_128 = arith.constant 0 : index
    %192 = vector.load %arg10[%c3_126, %c0_127, %c0_128] : memref<4x8x32xf32, #tpu.memory_space<vmem>>, vector<1x8x32xf32>
    %193 = vector.shape_cast %192 : vector<1x8x32xf32> to vector<8x32xf32>
    %cst_129 = arith.constant dense<0.000000e+00> : vector<8x32xf32>
    %194 = tpu.matmul %191, %193, %cst_129 {dimension_numbers = #tpu.dot_dimension_numbers<[1], [0], [0], [1], [0, 0, 1, 1], [], []>} : vector<8x8xf32>, vector<8x32xf32>, vector<8x32xf32> -> vector<8x32xf32>
    %195 = arith.addf %155, %194 : vector<8x32xf32>
    %c0_130 = arith.constant 0 : index
    %c0_131 = arith.constant 0 : index
    %c0_132 = arith.constant 0 : index
    %196 = vector.load %arg12[%c0_130, %c0_131, %c0_132] : memref<1x8x32xf32, #tpu.memory_space<vmem>>, vector<1x8x32xf32>
    %197 = vector.shape_cast %196 : vector<1x8x32xf32> to vector<8x32xf32>
    %198 = vector.shape_cast %195 : vector<8x32xf32> to vector<1x8x32xf32>
    tpu.vector_store %arg12[%c0_130, %c0_131, %c0_132], %198 {strides = array<i32>} : memref<1x8x32xf32, #tpu.memory_space<vmem>>, vector<1x8x32xf32>,
    return
  }
  func.func @transform_0(%arg0: i32) -> (i32, i32, i32) {
    %c0_i32 = arith.constant 0 : i32
    %c0_i32_0 = arith.constant 0 : i32
    %c0_i32_1 = arith.constant 0 : i32
    return %arg0, %c0_i32, %c0_i32_0 : i32, i32, i32
  }
  func.func @transform_1(%arg0: i32) -> (i32, i32) {
    %c0_i32 = arith.constant 0 : i32
    %c0_i32_0 = arith.constant 0 : i32
    %c0_i32_1 = arith.constant 0 : i32
    return %c0_i32, %c0_i32_0 : i32, i32
  }
  func.func @transform_2(%arg0: i32) -> (i32, i32) {
    %c0_i32 = arith.constant 0 : i32
    %c0_i32_0 = arith.constant 0 : i32
    %c0_i32_1 = arith.constant 0 : i32
    return %c0_i32, %c0_i32_0 : i32, i32
  }
  func.func @transform_3(%arg0: i32) -> (i32, i32, i32) {
    %c0_i32 = arith.constant 0 : i32
    %c0_i32_0 = arith.constant 0 : i32
    %c0_i32_1 = arith.constant 0 : i32
    %c0_i32_2 = arith.constant 0 : i32
    return %c0_i32, %c0_i32_0, %c0_i32_1 : i32, i32, i32
  }
  func.func @transform_4(%arg0: i32) -> (i32, i32, i32) {
    %c0_i32 = arith.constant 0 : i32
    %c0_i32_0 = arith.constant 0 : i32
    %c0_i32_1 = arith.constant 0 : i32
    %c0_i32_2 = arith.constant 0 : i32
    return %c0_i32, %c0_i32_0, %c0_i32_1 : i32, i32, i32
  }
  func.func @transform_5(%arg0: i32) -> (i32, i32, i32) {
    %c0_i32 = arith.constant 0 : i32
    %c0_i32_0 = arith.constant 0 : i32
    %c0_i32_1 = arith.constant 0 : i32
    %c0_i32_2 = arith.constant 0 : i32
    return %c0_i32, %c0_i32_0, %c0_i32_1 : i32, i32, i32
  }
  func.func @transform_6(%arg0: i32) -> (i32, i32, i32) {
    %c0_i32 = arith.constant 0 : i32
    %c0_i32_0 = arith.constant 0 : i32
    %c0_i32_1 = arith.constant 0 : i32
    %c0_i32_2 = arith.constant 0 : i32
    return %c0_i32, %c0_i32_0, %c0_i32_1 : i32, i32, i32
  }
  func.func @transform_7(%arg0: i32) -> (i32, i32, i32) {
    %c0_i32 = arith.constant 0 : i32
    %c0_i32_0 = arith.constant 0 : i32
    %c0_i32_1 = arith.constant 0 : i32
    %c0_i32_2 = arith.constant 0 : i32
    return %c0_i32, %c0_i32_0, %c0_i32_1 : i32, i32, i32
  }
  func.func @transform_8(%arg0: i32) -> (i32, i32, i32) {
    %c0_i32 = arith.constant 0 : i32
    %c0_i32_0 = arith.constant 0 : i32
    %c0_i32_1 = arith.constant 0 : i32
    %c0_i32_2 = arith.constant 0 : i32
    return %c0_i32, %c0_i32_0, %c0_i32_1 : i32, i32, i32
  }
  func.func @transform_9(%arg0: i32) -> (i32, i32, i32) {
    %c0_i32 = arith.constant 0 : i32
    %c0_i32_0 = arith.constant 0 : i32
    %c0_i32_1 = arith.constant 0 : i32
    %c0_i32_2 = arith.constant 0 : i32
    return %c0_i32, %c0_i32_0, %c0_i32_1 : i32, i32, i32
  }
  func.func @transform_10(%arg0: i32) -> (i32, i32) {
    %c0_i32 = arith.constant 0 : i32
    %c0_i32_0 = arith.constant 0 : i32
    %c0_i32_1 = arith.constant 0 : i32
    return %c0_i32, %c0_i32_0 : i32, i32
  }
  func.func @transform_11(%arg0: i32) -> (i32, i32, i32) {
    %c0_i32 = arith.constant 0 : i32
    %c0_i32_0 = arith.constant 0 : i32
    %c0_i32_1 = arith.constant 0 : i32
    return %arg0, %c0_i32, %c0_i32_0 : i32, i32, i32
  }
}

module attributes {stable_mosaic.version = 11 : i64} {
  func.func @_mlp_block_kernel(%arg0: i32, %arg1: memref<16x32xf32, #tpu.memory_space<vmem>>, %arg2: memref<1x32xf32, #tpu.memory_space<vmem>>, %arg3: memref<1x32xf32, #tpu.memory_space<vmem>>, %arg4: memref<32x128xf32, #tpu.memory_space<vmem>>, %arg5: memref<1x128xf32, #tpu.memory_space<vmem>>, %arg6: memref<128x32xf32, #tpu.memory_space<vmem>>, %arg7: memref<1x32xf32, #tpu.memory_space<vmem>>, %arg8: memref<16x32xf32, #tpu.memory_space<vmem>>) attributes {dimension_semantics = [#tpu.dimension_semantics<parallel>], iteration_bounds = array<i64: 1>, scalar_prefetch = 0 : i64, scratch_operands = 0 : i64, tpu.core_type = #tpu.core_type<tc>, window_params = [{transform_indices = @transform_0, window_bounds = array<i64: 16, 32>}, {pipeline_mode = #tpu.pipeline_mode<synchronous>, transform_indices = @transform_1, window_bounds = array<i64: 1, 32>}, {pipeline_mode = #tpu.pipeline_mode<synchronous>, transform_indices = @transform_2, window_bounds = array<i64: 1, 32>}, {pipeline_mode = #tpu.pipeline_mode<synchronous>, transform_indices = @transform_3, window_bounds = array<i64: 32, 128>}, {pipeline_mode = #tpu.pipeline_mode<synchronous>, transform_indices = @transform_4, window_bounds = array<i64: 1, 128>}, {pipeline_mode = #tpu.pipeline_mode<synchronous>, transform_indices = @transform_5, window_bounds = array<i64: 128, 32>}, {pipeline_mode = #tpu.pipeline_mode<synchronous>, transform_indices = @transform_6, window_bounds = array<i64: 1, 32>}, {transform_indices = @transform_7, window_bounds = array<i64: 16, 32>}]} {
    %c0 = arith.constant 0 : index
    %c0_0 = arith.constant 0 : index
    %0 = vector.load %arg1[%c0, %c0_0] : memref<16x32xf32, #tpu.memory_space<vmem>>, vector<16x32xf32>
    %cst = arith.constant dense<0.000000e+00> : vector<16xf32>
    %1 = vector.multi_reduction <add>, %0, %cst [1] : vector<16x32xf32> to vector<16xf32>
    %2 = vector.shape_cast %1 : vector<16xf32> to vector<16x1xf32>
    %cst_1 = arith.constant 3.200000e+01 : f32
    %3 = vector.broadcast %cst_1 : f32 to vector<16x1xf32>
    %4 = arith.divf %2, %3 : vector<16x1xf32>
    %5 = vector.broadcast %4 : vector<16x1xf32> to vector<16x32xf32>
    %6 = arith.subf %0, %5 : vector<16x32xf32>
    %7 = arith.mulf %6, %6 : vector<16x32xf32>
    %cst_2 = arith.constant dense<0.000000e+00> : vector<16xf32>
    %8 = vector.multi_reduction <add>, %7, %cst_2 [1] : vector<16x32xf32> to vector<16xf32>
    %9 = vector.shape_cast %8 : vector<16xf32> to vector<16x1xf32>
    %cst_3 = arith.constant 3.200000e+01 : f32
    %10 = vector.broadcast %cst_3 : f32 to vector<16x1xf32>
    %11 = arith.divf %9, %10 : vector<16x1xf32>
    %12 = vector.broadcast %4 : vector<16x1xf32> to vector<16x32xf32>
    %13 = arith.subf %0, %12 : vector<16x32xf32>
    %cst_4 = arith.constant 9.99999974E-6 : f32
    %14 = vector.broadcast %cst_4 : f32 to vector<16x1xf32>
    %15 = arith.addf %11, %14 : vector<16x1xf32>
    %16 = math.rsqrt %15 : vector<16x1xf32>
    %17 = vector.broadcast %16 : vector<16x1xf32> to vector<16x32xf32>
    %18 = arith.mulf %13, %17 : vector<16x32xf32>
    %c0_5 = arith.constant 0 : index
    %c0_6 = arith.constant 0 : index
    %19 = vector.load %arg2[%c0_5, %c0_6] : memref<1x32xf32, #tpu.memory_space<vmem>>, vector<1x32xf32>
    %20 = vector.broadcast %19 : vector<1x32xf32> to vector<16x32xf32>
    %21 = arith.mulf %18, %20 : vector<16x32xf32>
    %c0_7 = arith.constant 0 : index
    %c0_8 = arith.constant 0 : index
    %22 = vector.load %arg3[%c0_7, %c0_8] : memref<1x32xf32, #tpu.memory_space<vmem>>, vector<1x32xf32>
    %23 = vector.broadcast %22 : vector<1x32xf32> to vector<16x32xf32>
    %24 = arith.addf %21, %23 : vector<16x32xf32>
    %c0_9 = arith.constant 0 : index
    %c0_10 = arith.constant 0 : index
    %25 = vector.load %arg4[%c0_9, %c0_10] : memref<32x128xf32, #tpu.memory_space<vmem>>, vector<32x128xf32>
    %cst_11 = arith.constant dense<0.000000e+00> : vector<16x128xf32>
    %26 = tpu.matmul %24, %25, %cst_11 {dimension_numbers = #tpu.dot_dimension_numbers<[1], [0], [0], [1], [0, 0, 1, 1], [], []>} : vector<16x32xf32>, vector<32x128xf32>, vector<16x128xf32> -> vector<16x128xf32>
    %c0_12 = arith.constant 0 : index
    %c0_13 = arith.constant 0 : index
    %27 = vector.load %arg5[%c0_12, %c0_13] : memref<1x128xf32, #tpu.memory_space<vmem>>, vector<1x128xf32>
    %28 = vector.broadcast %27 : vector<1x128xf32> to vector<16x128xf32>
    %29 = arith.addf %26, %28 : vector<16x128xf32>
    %cst_14 = arith.constant 1.702000e+00 : f32
    %30 = vector.broadcast %cst_14 : f32 to vector<16x128xf32>
    %31 = arith.mulf %30, %29 : vector<16x128xf32>
    %32 = arith.negf %31 : vector<16x128xf32>
    %33 = math.exp %32 : vector<16x128xf32>
    %cst_15 = arith.constant 1.000000e+00 : f32
    %34 = vector.broadcast %cst_15 : f32 to vector<16x128xf32>
    %35 = arith.addf %34, %33 : vector<16x128xf32>
    %36 = arith.divf %34, %35 : vector<16x128xf32>
    %37 = arith.mulf %29, %36 : vector<16x128xf32>
    %c0_16 = arith.constant 0 : index
    %c0_17 = arith.constant 0 : index
    %38 = vector.load %arg6[%c0_16, %c0_17] : memref<128x32xf32, #tpu.memory_space<vmem>>, vector<128x32xf32>
    %cst_18 = arith.constant dense<0.000000e+00> : vector<16x32xf32>
    %39 = tpu.matmul %37, %38, %cst_18 {dimension_numbers = #tpu.dot_dimension_numbers<[1], [0], [0], [1], [0, 0, 1, 1], [], []>} : vector<16x128xf32>, vector<128x32xf32>, vector<16x32xf32> -> vector<16x32xf32>
    %c0_19 = arith.constant 0 : index
    %c0_20 = arith.constant 0 : index
    %40 = vector.load %arg7[%c0_19, %c0_20] : memref<1x32xf32, #tpu.memory_space<vmem>>, vector<1x32xf32>
    %41 = vector.broadcast %40 : vector<1x32xf32> to vector<16x32xf32>
    %42 = arith.addf %39, %41 : vector<16x32xf32>
    %43 = arith.addf %0, %42 : vector<16x32xf32>
    %c0_21 = arith.constant 0 : index
    %c0_22 = arith.constant 0 : index
    %44 = vector.load %arg8[%c0_21, %c0_22] : memref<16x32xf32, #tpu.memory_space<vmem>>, vector<16x32xf32>
    tpu.vector_store %arg8[%c0_21, %c0_22], %43 {strides = array<i32>} : memref<16x32xf32, #tpu.memory_space<vmem>>, vector<16x32xf32>,
    return
  }
  func.func @transform_0(%arg0: i32) -> (i32, i32) {
    %c0_i32 = arith.constant 0 : i32
    %c0_i32_0 = arith.constant 0 : i32
    return %arg0, %c0_i32 : i32, i32
  }
  func.func @transform_1(%arg0: i32) -> (i32, i32) {
    %c0_i32 = arith.constant 0 : i32
    %c0_i32_0 = arith.constant 0 : i32
    %c0_i32_1 = arith.constant 0 : i32
    return %c0_i32, %c0_i32_0 : i32, i32
  }
  func.func @transform_2(%arg0: i32) -> (i32, i32) {
    %c0_i32 = arith.constant 0 : i32
    %c0_i32_0 = arith.constant 0 : i32
    %c0_i32_1 = arith.constant 0 : i32
    return %c0_i32, %c0_i32_0 : i32, i32
  }
  func.func @transform_3(%arg0: i32) -> (i32, i32) {
    %c0_i32 = arith.constant 0 : i32
    %c0_i32_0 = arith.constant 0 : i32
    %c0_i32_1 = arith.constant 0 : i32
    return %c0_i32, %c0_i32_0 : i32, i32
  }
  func.func @transform_4(%arg0: i32) -> (i32, i32) {
    %c0_i32 = arith.constant 0 : i32
    %c0_i32_0 = arith.constant 0 : i32
    %c0_i32_1 = arith.constant 0 : i32
    return %c0_i32, %c0_i32_0 : i32, i32
  }
  func.func @transform_5(%arg0: i32) -> (i32, i32) {
    %c0_i32 = arith.constant 0 : i32
    %c0_i32_0 = arith.constant 0 : i32
    %c0_i32_1 = arith.constant 0 : i32
    return %c0_i32, %c0_i32_0 : i32, i32
  }
  func.func @transform_6(%arg0: i32) -> (i32, i32) {
    %c0_i32 = arith.constant 0 : i32
    %c0_i32_0 = arith.constant 0 : i32
    %c0_i32_1 = arith.constant 0 : i32
    return %c0_i32, %c0_i32_0 : i32, i32
  }
  func.func @transform_7(%arg0: i32) -> (i32, i32) {
    %c0_i32 = arith.constant 0 : i32
    %c0_i32_0 = arith.constant 0 : i32
    return %arg0, %c0_i32 : i32, i32
  }
}

module attributes {stable_mosaic.version = 11 : i64} {
  func.func @_final_ln_proj_kernel(%arg0: i32, %arg1: memref<2x32xf32, #tpu.memory_space<vmem>>, %arg2: memref<1x32xf32, #tpu.memory_space<vmem>>, %arg3: memref<1x32xf32, #tpu.memory_space<vmem>>, %arg4: memref<32x32xf32, #tpu.memory_space<vmem>>, %arg5: memref<2x32xf32, #tpu.memory_space<vmem>>) attributes {dimension_semantics = [#tpu.dimension_semantics<arbitrary>], iteration_bounds = array<i64: 1>, scalar_prefetch = 0 : i64, scratch_operands = 0 : i64, tpu.core_type = #tpu.core_type<tc>, window_params = [{pipeline_mode = #tpu.pipeline_mode<synchronous>, transform_indices = @transform_0, window_bounds = array<i64: 2, 32>}, {pipeline_mode = #tpu.pipeline_mode<synchronous>, transform_indices = @transform_1, window_bounds = array<i64: 1, 32>}, {pipeline_mode = #tpu.pipeline_mode<synchronous>, transform_indices = @transform_2, window_bounds = array<i64: 1, 32>}, {pipeline_mode = #tpu.pipeline_mode<synchronous>, transform_indices = @transform_3, window_bounds = array<i64: 32, 32>}, {pipeline_mode = #tpu.pipeline_mode<synchronous>, transform_indices = @transform_4, window_bounds = array<i64: 2, 32>}]} {
    %c0 = arith.constant 0 : index
    %c0_0 = arith.constant 0 : index
    %0 = vector.load %arg1[%c0, %c0_0] : memref<2x32xf32, #tpu.memory_space<vmem>>, vector<2x32xf32>
    %cst = arith.constant dense<0.000000e+00> : vector<2xf32>
    %1 = vector.multi_reduction <add>, %0, %cst [1] : vector<2x32xf32> to vector<2xf32>
    %2 = vector.shape_cast %1 : vector<2xf32> to vector<2x1xf32>
    %cst_1 = arith.constant 3.200000e+01 : f32
    %3 = vector.broadcast %cst_1 : f32 to vector<2x1xf32>
    %4 = arith.divf %2, %3 : vector<2x1xf32>
    %5 = vector.broadcast %4 : vector<2x1xf32> to vector<2x32xf32>
    %6 = arith.subf %0, %5 : vector<2x32xf32>
    %7 = arith.mulf %6, %6 : vector<2x32xf32>
    %cst_2 = arith.constant dense<0.000000e+00> : vector<2xf32>
    %8 = vector.multi_reduction <add>, %7, %cst_2 [1] : vector<2x32xf32> to vector<2xf32>
    %9 = vector.shape_cast %8 : vector<2xf32> to vector<2x1xf32>
    %cst_3 = arith.constant 3.200000e+01 : f32
    %10 = vector.broadcast %cst_3 : f32 to vector<2x1xf32>
    %11 = arith.divf %9, %10 : vector<2x1xf32>
    %12 = vector.broadcast %4 : vector<2x1xf32> to vector<2x32xf32>
    %13 = arith.subf %0, %12 : vector<2x32xf32>
    %cst_4 = arith.constant 9.99999974E-6 : f32
    %14 = vector.broadcast %cst_4 : f32 to vector<2x1xf32>
    %15 = arith.addf %11, %14 : vector<2x1xf32>
    %16 = math.rsqrt %15 : vector<2x1xf32>
    %17 = vector.broadcast %16 : vector<2x1xf32> to vector<2x32xf32>
    %18 = arith.mulf %13, %17 : vector<2x32xf32>
    %c0_5 = arith.constant 0 : index
    %c0_6 = arith.constant 0 : index
    %19 = vector.load %arg2[%c0_5, %c0_6] : memref<1x32xf32, #tpu.memory_space<vmem>>, vector<1x32xf32>
    %20 = vector.broadcast %19 : vector<1x32xf32> to vector<2x32xf32>
    %21 = arith.mulf %18, %20 : vector<2x32xf32>
    %c0_7 = arith.constant 0 : index
    %c0_8 = arith.constant 0 : index
    %22 = vector.load %arg3[%c0_7, %c0_8] : memref<1x32xf32, #tpu.memory_space<vmem>>, vector<1x32xf32>
    %23 = vector.broadcast %22 : vector<1x32xf32> to vector<2x32xf32>
    %24 = arith.addf %21, %23 : vector<2x32xf32>
    %c0_9 = arith.constant 0 : index
    %c0_10 = arith.constant 0 : index
    %25 = vector.load %arg4[%c0_9, %c0_10] : memref<32x32xf32, #tpu.memory_space<vmem>>, vector<32x32xf32>
    %cst_11 = arith.constant dense<0.000000e+00> : vector<2x32xf32>
    %26 = tpu.matmul %24, %25, %cst_11 {dimension_numbers = #tpu.dot_dimension_numbers<[1], [0], [0], [1], [0, 0, 1, 1], [], []>} : vector<2x32xf32>, vector<32x32xf32>, vector<2x32xf32> -> vector<2x32xf32>
    %c0_12 = arith.constant 0 : index
    %c0_13 = arith.constant 0 : index
    %27 = vector.load %arg5[%c0_12, %c0_13] : memref<2x32xf32, #tpu.memory_space<vmem>>, vector<2x32xf32>
    tpu.vector_store %arg5[%c0_12, %c0_13], %26 {strides = array<i32>} : memref<2x32xf32, #tpu.memory_space<vmem>>, vector<2x32xf32>,
    return
  }
  func.func @transform_0(%arg0: i32) -> (i32, i32) {
    %c0_i32 = arith.constant 0 : i32
    %c0_i32_0 = arith.constant 0 : i32
    %c0_i32_1 = arith.constant 0 : i32
    return %c0_i32, %c0_i32_0 : i32, i32
  }
  func.func @transform_1(%arg0: i32) -> (i32, i32) {
    %c0_i32 = arith.constant 0 : i32
    %c0_i32_0 = arith.constant 0 : i32
    %c0_i32_1 = arith.constant 0 : i32
    return %c0_i32, %c0_i32_0 : i32, i32
  }
  func.func @transform_2(%arg0: i32) -> (i32, i32) {
    %c0_i32 = arith.constant 0 : i32
    %c0_i32_0 = arith.constant 0 : i32
    %c0_i32_1 = arith.constant 0 : i32
    return %c0_i32, %c0_i32_0 : i32, i32
  }
  func.func @transform_3(%arg0: i32) -> (i32, i32) {
    %c0_i32 = arith.constant 0 : i32
    %c0_i32_0 = arith.constant 0 : i32
    %c0_i32_1 = arith.constant 0 : i32
    return %c0_i32, %c0_i32_0 : i32, i32
  }
  func.func @transform_4(%arg0: i32) -> (i32, i32) {
    %c0_i32 = arith.constant 0 : i32
    %c0_i32_0 = arith.constant 0 : i32
    %c0_i32_1 = arith.constant 0 : i32
    return %c0_i32, %c0_i32_0 : i32, i32
  }
}

</mosaic_0001>

<bundles_post_ra>
// kernel: text_encoder_forward.8
= control target key start
LH: loop header
LB: loop body
LE: loop exit
PB: predicated region body
PF: predicated region fallthrough
CT: control target
= control target key end

     0   :  { %vm28_vm0 = vcmask 261120   ;;  %s560_s0 = inlined_call_operand.vmem [shape: f32[16,32], index: 0, kind: input, shape index: {}]   ;;  %s561_s3 = inlined_call_operand.vmem [shape: f32[32,128], index: 3, kind: input, shape index: {}]   ;;  %s562_s1 = inlined_call_operand.vmem [shape: f32[1,32], index: 1, kind: input, shape index: {}]   ;;  %s563_s2 = inlined_call_operand.vmem [shape: f32[1,32], index: 2, kind: input, shape index: {}]   ;;  %s564_s5 = inlined_call_operand.vmem [shape: f32[128,32], index: 5, kind: input, shape index: {}]   ;;  %s565_s4 = inlined_call_operand.vmem [shape: f32[1,128], index: 4, kind: input, shape index: {}]   ;;  %s566_s6 = inlined_call_operand.vmem [shape: f32[1,32], index: 6, kind: input, shape index: {}]   ;;  %s567_s7 = inlined_call_operand.vmem [shape: f32[16,32], index: 7, kind: output, shape index: {}]  }
   0x1   :  { %v461_v0 = vld [vmem:[%s560_s0] sm:$0xff]  ;;  %v466_v1 = vld [vmem:[%s560_s0 + $0x8] sm:$0xff]  ;;  %v76_v16 = vld [vmem:[%s561_s3 + $0x10] sm:$0xff] }
   0x2   :  { %v29_v2 = vsel %vm28_vm0, %v461_v0, 0.0  ;;  %v32_v3 = vsel %vm28_vm0, %v466_v1, 0.0  ;;  %v74_v14 = vld [vmem:[%s561_s3] sm:$0xff]  ;;  %v75_v15 = vld [vmem:[%s561_s3 + $0x8] sm:$0xff]  ;;  %v77_v18 = vld [vmem:[%s561_s3 + $0x18] sm:$0xff] }
   0x3   :  { %30 = vadd.xlane.f32.xlu0 %v29_v2  ;;  %v366_v17 = vpack.c.bf16 %v75_v15, %v74_v14  ;;  %v370_v19 = vpack.c.bf16 %v77_v18, %v76_v16  ;;  %v288_v27 = vld [vmem:[%s562_s1] ss:$0 sm:$0xff]  ;;  %v183_v37 = vld [vmem:[%s564_s5 + $0x8] sm:$0xff]  ;;  %v184_v39 = vld [vmem:[%s564_s5 + $0x10] sm:$0xff] }
   0x4   :  { %v289_v29 = vld [vmem:[%s563_s2] ss:$0 sm:$0xff]  ;;  %v185_v40 = vld [vmem:[%s564_s5 + $0x18] sm:$0xff]  ;;  %v187_v43 = vld [vmem:[%s564_s5 + $0x28] sm:$0xff] }
   0x5   :  { %367 = vmatprep.subr.bf16.mxu0 %v366_v17  ;;  %v182_v36 = vld [vmem:[%s564_s5] sm:$0xff]  ;;  %v378_v41 = vpack.c.bf16 %v185_v40, %v184_v39  ;;  %v188_v45 = vld [vmem:[%s564_s5 + $0x30] sm:$0xff]  ;;  %v189_v46 = vld [vmem:[%s564_s5 + $0x38] sm:$0xff] }
   0x6   :  { %369 = vmatpush3.bf16.msra.mxu0 %v366_v17  ;;  %v374_v38 = vpack.c.bf16 %v183_v37, %v182_v36  ;;  %v186_v42 = vld [vmem:[%s564_s5 + $0x20] sm:$0xff]  ;;  %v386_v47 = vpack.c.bf16 %v189_v46, %v188_v45  ;;  %v191_v49 = vld [vmem:[%s564_s5 + $0x48] sm:$0xff]  ;;  %v192_v51 = vld [vmem:[%s564_s5 + $0x50] sm:$0xff] }
   0x7   :  { %33 = vadd.xlane.f32.xlu0 %v32_v3  ;;  %371 = vmatprep.subr.bf16.mxu0 %v370_v19  ;;  %v382_v44 = vpack.c.bf16 %v187_v43, %v186_v42  ;;  %v190_v48 = vld [vmem:[%s564_s5 + $0x40] sm:$0xff]  ;;  %v193_v52 = vld [vmem:[%s564_s5 + $0x58] sm:$0xff]  ;;  %v195_v55 = vld [vmem:[%s564_s5 + $0x68] sm:$0xff] }
   0x8   :  { %375 = vmatprep.subr.bf16.mxu1 %v374_v38  ;;  %v390_v50 = vpack.c.bf16 %v191_v49, %v190_v48  ;;  %v394_v53 = vpack.c.bf16 %v193_v52, %v192_v51  ;;  %v194_v54 = vld [vmem:[%s564_s5 + $0x60] sm:$0xff]  ;;  %v196_v57 = vld [vmem:[%s564_s5 + $0x70] sm:$0xff]  ;;  %v197_v58 = vld [vmem:[%s564_s5 + $0x78] sm:$0xff] }
   0x9   :  { %377 = vmatpush3.bf16.msra.mxu1 %v374_v38  ;;  %v398_v56 = vpack.c.bf16 %v195_v55, %v194_v54  ;;  %v402_v59 = vpack.c.bf16 %v197_v58, %v196_v57  ;;  %v290_v60 = vld [vmem:[%s565_s4] ss:$0 sm:$0xff] }
   0xa   :  { %373 = vmatpush3.bf16.msra.mxu0 %v370_v19  ;;  %379 = vmatprep.subr.bf16.mxu1 %v378_v41  ;;  %v295_v15 = vld [vmem:[%s566_s6] ss:$0 sm:$0xff] }
   0xd   :  { %381 = vmatpush3.bf16.msra.mxu1 %v378_v41 }
   0xe   :  { %383 = vmatprep.subr.bf16.mxu1 %v382_v44 }
  0x11   :  { %385 = vmatpush3.bf16.msra.mxu1 %v382_v44 }
  0x12   :  { %387 = vmatprep.subr.bf16.mxu1 %v386_v47 }
  0x15   :  { %389 = vmatpush3.bf16.msra.mxu1 %v386_v47 }
  0x16   :  { %391 = vmatprep.subr.bf16.mxu1 %v390_v50 }
  0x19   :  { %393 = vmatpush3.bf16.msra.mxu1 %v390_v50 }
  0x1a   :  { %395 = vmatprep.subr.bf16.mxu1 %v394_v53 }
  0x1d   :  { %397 = vmatpush3.bf16.msra.mxu1 %v394_v53 }
  0x1e   :  { %399 = vmatprep.subr.bf16.mxu1 %v398_v56 }
  0x21   :  { %401 = vmatpush3.bf16.msra.mxu1 %v398_v56 }
  0x22   :  { %403 = vmatprep.subr.bf16.mxu1 %v402_v59 }
  0x25   :  { %405 = vmatpush3.bf16.msra.mxu1 %v402_v59 }
  0x90   :  { %v31_v4 = vpop.xlane.xlu0 %30 }
  0x91   :  { %v36_v5 = vmul.f32 0.03125, %v31_v4 }
  0x93   :  { %v38_v6 = vsub.f32 %v461_v0, %v36_v5 }
  0x94   :  { %v34_v7 = vpop.xlane.xlu0 %33 }
  0x95   :  { %v37_v8 = vmul.f32 0.03125, %v34_v7  ;;  %v40_v9 = vmul.f32 %v38_v6, %v38_v6 }
  0x97   :  { %v39_v10 = vsub.f32 %v466_v1, %v37_v8  ;;  %v42_v11 = vsel %vm28_vm0, %v40_v9, 0.0 }
  0x98   :  { %43 = vadd.xlane.f32.xlu1 %v42_v11 }
  0x99   :  { %v41_v12 = vmul.f32 %v39_v10, %v39_v10 }
  0x9b   :  { %v45_v13 = vsel %vm28_vm0, %v41_v12, 0.0 }
  0x9c   :  { %46 = vadd.xlane.f32.xlu1 %v45_v13 }
 0x125   :  { %v44_v20 = vpop.xlane.xlu1 %43 }
 0x126   :  { %v48_v21 = vmul.f32 0.03125, %v44_v20 }
 0x128   :  { %v50_v22 = vadd.f32 1e-05, %v48_v21 }
 0x129   :  { %v47_v23 = vpop.xlane.xlu1 %46 }
 0x12a   :  { %406 = vrsqrt.f32 %v50_v22  ;;  %v49_v24 = vmul.f32 0.03125, %v47_v23 }
 0x12c   :  { %v51_v25 = vadd.f32 1e-05, %v49_v24 }
 0x12e   :  { %408 = vrsqrt.f32 %v51_v25 }
 0x134   :  { %v407_v26 = vpop.eup %406 }
 0x135   :  { %v54_v28 = vmul.f32 %v407_v26, %v38_v6 }
 0x137   :  { %v63_v30 = vmul.f32 %v288_v27, %v54_v28 }
 0x138   :  { %v409_v31 = vpop.eup %408 }
 0x139   :  { %v55_v32 = vmul.f32 %v409_v31, %v39_v10  ;;  %v72_v33 = vadd.f32 %v289_v29, %v63_v30 }
 0x13b   :  { %v64_v34 = vmul.f32 %v288_v27, %v55_v32  ;;  %328 = vmatprep.mubr.msk.f32.mxu0 %vm28_vm0, %v72_v33 }
 0x13d   :  { %v73_v35 = vadd.f32 %v289_v29, %v64_v34 }
 0x13f   :  { %329 = vmatmul.mubr.msk.f32.vlgmr.msra.gmra.mrb[0].mxu0 %vm28_vm0, %v73_v35 }
 0x212   :  { %v330_v61 = vpop.f32.mrb[0].mxu0 }
 0x213   :  { %v163_v62 = vadd.f32 %v330_v61, %v290_v60  ;;  %v157_v63 = vpop.f32.mrb[1].mxu0 }
 0x214   :  { %v158_v2 = vadd.f32 %v290_v60, %v157_v63 }
 0x215   :  { %v294_v3 = vmul.f32 -1.702, %v163_v62 }
 0x216   :  { %v293_v4 = vmul.f32 -1.702, %v158_v2 }
 0x217   :  { %v172_v5 = vmul.f32 1.442695, %v294_v3 }
 0x218   :  { %v170_v6 = vmul.f32 1.442695, %v293_v4 }
 0x219   :  { %410 = vpow2.f32 %v172_v5 }
 0x21a   :  { %412 = vpow2.f32 %v170_v6 }
 0x223   :  { %v411_v7 = vpop.eup %410 }
 0x224   :  { %v413_v8 = vpop.eup %412  ;;  %v175_v9 = vadd.f32 1.0, %v411_v7 }
 0x225   :  { %v174_v10 = vadd.f32 1.0, %v413_v8 }
 0x226   :  { %414 = vrcp.f32 %v175_v9 }
 0x227   :  { %416 = vrcp.f32 %v174_v10 }
 0x230   :  { %v415_v11 = vpop.eup %414 }
 0x231   :  { %v417_v12 = vpop.eup %416  ;;  %v181_v14 = vmul.f32 %v415_v11, %v163_v62 }
 0x232   :  { %v180_v13 = vmul.f32 %v417_v12, %v158_v2 }
 0x234   :  { %363 = vmatprep.mubr.f32.mxu1 %v180_v13 }
 0x235   :  { %364 = vmatmul.mubr.f32.vlgmr.msra.gmra.mrb[0].mxu1 %v181_v14 }
 0x308   :  { %v365_v16 = vpop.f32.mrb[0].mxu1 }
 0x309   :  { %v277_v17 = vadd.f32 %v365_v16, %v295_v15  ;;  %v271_v18 = vpop.f32.mrb[1].mxu1 }
 0x30a   :  { %v272_v19 = vadd.f32 %v295_v15, %v271_v18 }
 0x30b   :  { %v281_v20 = vadd.f32 %v277_v17, %v466_v1 }
 0x30c   :  { %v280_v21 = vadd.f32 %v272_v19, %v461_v0 }
 0x30d   :  { %283 = vst.msk [vmem:[%s567_s7 + $0x8] sm:$0xff] %vm28_vm0, %v281_v20 }
 0x30e   :  { %282 = vst.msk [vmem:[%s567_s7] sm:$0xff] %vm28_vm0, %v280_v21 }

// kernel: text_encoder_forward.13
= control target key start
LH: loop header
LB: loop body
LE: loop exit
PB: predicated region body
PF: predicated region fallthrough
CT: control target
= control target key end

     0   :  { %vm19_vm0 = vcmask 254976   ;;  %s263_s0 = inlined_call_operand.vmem [shape: f32[2,32], index: 0, kind: input, shape index: {}]   ;;  %s264_s1 = inlined_call_operand.vmem [shape: f32[1,32], index: 1, kind: input, shape index: {}]   ;;  %s265_s2 = inlined_call_operand.vmem [shape: f32[1,32], index: 2, kind: input, shape index: {}]   ;;  %s266_s3 = inlined_call_operand.vmem [shape: f32[32,32], index: 3, kind: input, shape index: {}]   ;;  %s267_s4 = inlined_call_operand.hbm [shape: f32[2,32], index: 4, kind: output, shape index: {}]  }
   0x1   :  { %v18_v0 = vld [vmem:[%s263_s0] sm:$0x3] }
   0x2   :  { %9 = vsyncpa [#allocation3], 0  ;;  %v20_v1 = vsel %vm19_vm0, %v18_v0, 0.0  ;;  %v50_v7 = vld [vmem:[%s266_s3] sm:$0xff]  ;;  %v51_v8 = vld [vmem:[%s266_s3 + $0x8] sm:$0xff]  ;;  %v198_v10 = vmov 0.0|0.0  }
   0x3   :  { %21 = vadd.xlane.f32.xlu0 %v20_v1  ;;  %v52_v9 = vld [vmem:[%s266_s3 + $0x10] sm:$0xff]  ;;  %162 = vmatprep.subr.bf16.mxu0 %v198_v10  ;;  %v163_v11 = vpack.c.bf16 %v51_v8, %v50_v7  ;;  %v53_v12 = vld [vmem:[%s266_s3 + $0x18] sm:$0xff]  ;;  %vm199_vm1 = vmmov 0   ;;  %v200_v13 = vmov 0.0   ;;  %v143_v19 = vld [vmem:[%s264_s1] ss:$0 sm:$0xff] }
   0x4   :  { %159 = vmatprep.mubr.msk.f32.mxu0 %vm199_vm1, %v200_v13  ;;  %v166_v14 = vpack.c.bf16 %v53_v12, %v52_v9  ;;  %v144_v21 = vld [vmem:[%s265_s2] ss:$0 sm:$0xff]  ;;  %vm54_vm2 = vcmask 261120   ;;  %s201_s3 = smov [#allocation2]  }
   0x5   :  { %164 = vmatpush3.bf16.msra.mxu0 %v163_v11  ;;  %s135_s28 = sshll.u32 %s201_s3, 4  ;;  %s136_s28 = int_to_ptr.vmem [resolvable:$true] %s135_s28 }
   0x6   :  { %165 = vmatprep.subr.bf16.mxu0 %v198_v10  ;;  %s174_s29 = scalar_lea.vmem %s136_s28, 32  ;;  %p179_p1 = scmp.lt.s32.totalorder %s136_s28, %s136_s28 }
   0x7   :  { %p175_p0 = scmp.ne.s32.totalorder %s136_s28, %s174_s29  ;;  %p180_p2 = scmp.lt.s32.totalorder %s174_s29, %s174_s29 }
   0x9   :  { %167 = vmatpush3.bf16.msra.mxu0 %v166_v14  ;;  %p181_p3 = por %p180_p2, %p179_p1 }
   0xb   :  { %p182_p4 = pnand %p181_p3, %p175_p0 }
  0x90   :  { %v22_v2 = vpop.xlane.xlu0 %21 }
  0x91   :  { %v24_v3 = vmul.f32 0.03125, %v22_v2 }
  0x93   :  { %v25_v4 = vsub.f32 %v18_v0, %v24_v3 }
  0x95   :  { %v26_v5 = vmul.f32 %v25_v4, %v25_v4 }
  0x97   :  { %v27_v6 = vsel %vm19_vm0, %v26_v5, 0.0 }
  0x98   :  { %28 = vadd.xlane.f32.xlu0 %v27_v6 }
 0x125   :  { %v29_v15 = vpop.xlane.xlu0 %28 }
 0x126   :  { %v30_v16 = vmul.f32 0.03125, %v29_v15 }
 0x128   :  { %v31_v17 = vadd.f32 1e-05, %v30_v16 }
 0x12a   :  { %172 = vrsqrt.f32 %v31_v17 }
 0x134   :  { %v173_v18 = vpop.eup %172 }
 0x135   :  { %v33_v20 = vmul.f32 %v173_v18, %v25_v4 }
 0x137   :  { %v41_v22 = vmul.f32 %v143_v19, %v33_v20 }
 0x139   :  { %v49_v23 = vadd.f32 %v144_v21, %v41_v22 }
 0x13b   :  { %160 = vmatmul.mubr.msk.f32.vlgmr.msra.gmra.mrb[0].mxu0 %vm54_vm2, %v49_v23 }
 0x20e   :  { %v124_v24 = vpop.f32.mrb[0].mxu0 }
 0x20f   :  { %128 = vst.msk [vmem:[#allocation2] sm:$0x3] %vm19_vm0, %v124_v24  ;;  %v161_v25 = vpop.f32.mrb[1].mxu0 }
 0x210   :  { %185 = shalt.err (!%p182_p4)
}
 0x211   :  { %s186_s30 = scalar_lea.hbm %s267_s4, 32 }
 0x212   :  { %p187_p5 = scmp.ne.s32.totalorder %s267_s4, %s186_s30  ;;  %p190_p6 = scmp.lt.u32.totalorder %s186_s30, %s267_s4 }
 0x214   :  { %p192_p7 = pnand %p190_p6, %p187_p5 }
 0x216   :  { %195 = shalt.err (!%p192_p7)
}
 0x217   :  { %138 = dma.vmem_to_hbm [thread:$0]  %s136_s28, 32, %s267_s4, [#allocation3]  }
 0x218   :  { %196 = dma.done.wait [#allocation3], 32  }
 0x219   :  { %197 = vsyncadd [#allocation3], 4294967264 }
 0x21a   :  { %142 = vsyncpa [#allocation3], 1 }

// kernel: text_encoder_forward.7
= control target key start
LH: loop header
LB: loop body
LE: loop exit
PB: predicated region body
PF: predicated region fallthrough
CT: control target
= control target key end

     0   :  { %s2980_s17 = smov 0   ;;  %s3357_s0 = inlined_call_operand.vmem [shape: f32[2,8,32], index: 0, kind: input, shape index: {}]   ;;  %s3358_s1 = inlined_call_operand.vmem [shape: f32[1,32], index: 1, kind: input, shape index: {}]   ;;  %s3359_s2 = inlined_call_operand.vmem [shape: f32[1,32], index: 2, kind: input, shape index: {}]   ;;  %s3360_s3 = inlined_call_operand.vmem [shape: f32[4,32,8], index: 3, kind: input, shape index: {}]   ;;  %s3361_s4 = inlined_call_operand.vmem [shape: f32[4,1,8], index: 4, kind: input, shape index: {}]   ;;  %s3362_s5 = inlined_call_operand.vmem [shape: f32[4,32,8], index: 5, kind: input, shape index: {}]   ;;  %s3363_s6 = inlined_call_operand.vmem [shape: f32[4,1,8], index: 6, kind: input, shape index: {}]   ;;  %s3364_s7 = inlined_call_operand.vmem [shape: f32[4,32,8], index: 7, kind: input, shape index: {}]   ;;  %s3365_s8 = inlined_call_operand.vmem [shape: f32[4,1,8], index: 8, kind: input, shape index: {}]   ;;  %s3366_s9 = inlined_call_operand.vmem [shape: f32[4,8,32], index: 9, kind: input, shape index: {}]   ;;  %s3367_s10 = inlined_call_operand.vmem [shape: f32[1,32], index: 10, kind: input, shape index: {}]   ;;  %s3368_s11 = inlined_call_operand.vmem [shape: f32[2,8,32], index: 11, kind: output, shape index: {}]  }
   0x1 LB: > { %s2425_s18 = sadd.s32 4294967295, %s2915_s17   ;;  %p2429_p0 = scmp.ge.s32.totalorder %s2915_s17, 1  ;;  %s2915_s17 = sphi %s2980_s17, %s21_s17  }
   0x2   : > { %p336_p1 = scmp.lt.s32.totalorder %s2915_s17, 3 }
   0x4   : > { %p337_p2 = pnand %p2429_p0, %p336_p1 }
   0x5   : > { %p374_p3 = scmp.lt.s32.totalorder (!%p337_p2), %s2425_s18, 1  ;;  %vm383_vm0 = vcmask (!%p337_p2), 261120   ;;  %v430_v7 = vld [vmem:[%s3360_s3] sm:$0xff] (!%p337_p2)  ;;  %v431_v8 = vld [vmem:[%s3360_s3 + $0x8] sm:$0xff] (!%p337_p2)  ;;  %v2917_v12 = vmov (!%p337_p2), 0.0|0.0   ;;  %v432_v14 = vld [vmem:[%s3360_s3 + $0x10] sm:$0xff] (!%p337_p2)  ;;  %v414_v59 = vlaneseq (!%p337_p2) }
   0x6   : > { %340 = sbr.rel (%p337_p2) target bundleno = 4396 (0x112c), region = 64  ;;  %v2803_v9 = vpack.c.bf16 (!%p337_p2), %v431_v8, %v430_v7  ;;  %v434_v10 = vld [vmem:[%s3362_s5] sm:$0xff] (!%p337_p2)  ;;  %v435_v11 = vld [vmem:[%s3362_s5 + $0x8] sm:$0xff] (!%p337_p2)  ;;  %2802 = vmatprep.subr.bf16.mxu0 (!%p337_p2), %v2917_v12  ;;  %2808 = vmatprep.subr.bf16.mxu1 (!%p337_p2), %v2917_v12  ;;  %v433_v15 = vld [vmem:[%s3360_s3 + $0x18] sm:$0xff] (!%p337_p2)  ;;  %vm2918_vm1 = vmmov (!%p337_p2), 0   ;;  %v2919_v20 = vmov (!%p337_p2), 0.0  }
   0x7   : > { %v2809_v13 = vpack.c.bf16 (!%p337_p2), %v435_v11, %v434_v10  ;;  %v2806_v16 = vpack.c.bf16 (!%p337_p2), %v433_v15, %v432_v14  ;;  %v436_v17 = vld [vmem:[%s3362_s5 + $0x10] sm:$0xff] (!%p337_p2)  ;;  %v437_v18 = vld [vmem:[%s3362_s5 + $0x18] sm:$0xff] (!%p337_p2)  ;;  %2618 = vmatprep.mubr.msk.f32.mxu0 (!%p337_p2), %vm2918_vm1, %v2919_v20  ;;  %2629 = vmatprep.mubr.msk.f32.mxu1 (!%p337_p2), %vm2918_vm1, %v2919_v20  ;;  %v2432_v25 = vld [vmem:[%s3358_s1] ss:$0 sm:$0xff] (!%p337_p2)  ;;  %vm677_vm2 = vcmask (!%p337_p2), 64512   ;;  %v415_v60 = vshrl.u32 (!%p337_p2), %v414_v59, 7 }
   0x8   : > { %2804 = vmatpush3.bf16.msra.mxu0 (!%p337_p2), %v2803_v9  ;;  %v2812_v19 = vpack.c.bf16 (!%p337_p2), %v437_v18, %v436_v17  ;;  %v438_v27 = vld [vmem:[%s3364_s7] sm:$0xff] (!%p337_p2)  ;;  %v439_v28 = vld [vmem:[%s3364_s7 + $0x8] sm:$0xff] (!%p337_p2)  ;;  %v440_v33 = vld [vmem:[%s3364_s7 + $0x10] sm:$0xff] (!%p337_p2)  ;;  %v417_v61 = vand.u32 (!%p337_p2), 127, %v414_v59 }
   0x9   : > { %2810 = vmatpush3.bf16.msra.mxu1 (!%p337_p2), %v2809_v13  ;;  %2805 = vmatprep.subr.bf16.mxu0 (!%p337_p2), %v2917_v12  ;;  %v2433_v29 = vld [vmem:[%s3359_s2] ss:$0 sm:$0xff] (!%p337_p2)  ;;  %v2815_v31 = vpack.c.bf16 (!%p337_p2), %v439_v28, %v438_v27  ;;  %v441_v34 = vld [vmem:[%s3364_s7 + $0x18] sm:$0xff] (!%p337_p2)  ;;  %v2451_v37 = vld [vmem:[%s3362_s5 + $0x28] sm:$0xff] (!%p337_p2) }
   0xa   : > { %2811 = vmatprep.subr.bf16.mxu1 (!%p337_p2), %v2917_v12  ;;  %v2818_v35 = vpack.c.bf16 (!%p337_p2), %v441_v34, %v440_v33  ;;  %v2450_v36 = vld [vmem:[%s3362_s5 + $0x20] sm:$0xff] (!%p337_p2)  ;;  %v2452_v39 = vld [vmem:[%s3362_s5 + $0x30] sm:$0xff] (!%p337_p2)  ;;  %v2453_v40 = vld [vmem:[%s3362_s5 + $0x38] sm:$0xff] (!%p337_p2)  ;;  %vm418_vm3 = vcmp.gt.s32.totalorder (!%p337_p2), %v417_v61, %v415_v60 }
   0xb   : > { %v2827_v38 = vpack.c.bf16 (!%p337_p2), %v2451_v37, %v2450_v36  ;;  %v2830_v41 = vpack.c.bf16 (!%p337_p2), %v2453_v40, %v2452_v39  ;;  %v2436_v42 = vld [vmem:[%s3361_s4] ss:$0 sm:$0xff] (!%p337_p2)  ;;  %v2462_v55 = vld [vmem:[%s3363_s6 + $0x1] ss:$0 sm:$0xff] (!%p337_p2)  ;;  %v2434_v62 = vsel (!%p337_p2), %vm418_vm3, 1.0, %v2919_v20  ;;  %v2448_v18 = vld [vmem:[%s3360_s3 + $0x30] sm:$0xff] (!%p337_p2) }
   0xc   : > { %2807 = vmatpush3.bf16.msra.mxu0 (!%p337_p2), %v2806_v16  ;;  %v2438_v43 = vld [vmem:[%s3363_s6] ss:$0 sm:$0xff] (!%p337_p2)  ;;  %v3109_v63 = vmul.f32 (!%p337_p2), -1e+30, %v2434_v62  ;;  %v2447_v16 = vld [vmem:[%s3360_s3 + $0x28] sm:$0xff] (!%p337_p2)  ;;  %v2456_v27 = vld [vmem:[%s3364_s7 + $0x30] sm:$0xff] (!%p337_p2) }
   0xd   : > { %s3370_s18 = smov (!%p374_p3, %s2425_s18), 1  ;;  %2813 = vmatpush3.bf16.msra.mxu1 %v2812_v19  ;;  %2814 = vmatprep.subr.bf16.mxu0 %v2917_v12  ;;  %v2440_v51 = vld [vmem:[%s3365_s8] ss:$0 sm:$0xff]  ;;  %v2449_v19 = vld [vmem:[%s3360_s3 + $0x38] sm:$0xff]  ;;  %v2474_v34 = vld [vmem:[%s3360_s3 + $0x50] sm:$0xff] }
   0xe   : > { %s2430_s19 = sshll.u32 %s3370_s18, 3  ;;  %2643 = vmatprep.subr.mxu1 %v2919_v20  ;;  %v838_v14 = vld [vmem:[%s3366_s9] sm:$0xff]  ;;  %v2457_v28 = vld [vmem:[%s3364_s7 + $0x38] sm:$0xff]  ;;  %v2482_v40 = vld [vmem:[%s3364_s7 + $0x50] sm:$0xff] }
   0xf   : > { %s377_s22 = scalar_lea.vmem %s3357_s0, %s2430_s19  ;;  %v2446_v15 = vld [vmem:[%s3360_s3 + $0x20] sm:$0xff]  ;;  %s381_s12 = scalar_lea.vmem %s3368_s11, %s2430_s19 }
  0x10   : > { %v2996_v0 = vld [vmem:[%s377_s22] sm:$0xff]  ;;  %v2821_v17 = vpack.c.bf16 %v2447_v16, %v2446_v15  ;;  %v2478_v15 = vld [vmem:[%s3362_s5 + $0x50] sm:$0xff]  ;;  %v2479_v16 = vld [vmem:[%s3362_s5 + $0x58] sm:$0xff] }
  0x11   : > { %v384_v1 = vsel %vm383_vm0, %v2996_v0, 0.0  ;;  %v2480_v37 = vld [vmem:[%s3364_s7 + $0x40] sm:$0xff] }
  0x12   : > { %385 = vadd.xlane.f32.xlu0 %v384_v1 }
  0x9f   : > { %v386_v2 = vpop.xlane.xlu0 %385 }
  0xa0   : > { %v388_v3 = vmul.f32 0.03125, %v386_v2 }
  0xa2   : > { %v389_v4 = vsub.f32 %v2996_v0, %v388_v3 }
  0xa4   : > { %v390_v5 = vmul.f32 %v389_v4, %v389_v4 }
  0xa6   : > { %v391_v6 = vsel %vm383_vm0, %v390_v5, 0.0 }
  0xa7   : > { %392 = vadd.xlane.f32.xlu0 %v391_v6 }
 0x134   : > { %v393_v21 = vpop.xlane.xlu0 %392 }
 0x135   : > { %v394_v22 = vmul.f32 0.03125, %v393_v21 }
 0x137   : > { %v395_v23 = vadd.f32 1e-05, %v394_v22 }
 0x139   : > { %2891 = vrsqrt.f32 %v395_v23  ;;  %v2824_v23 = vpack.c.bf16 %v2449_v19, %v2448_v18  ;;  %v2848_v19 = vpack.c.bf16 %v2479_v16, %v2478_v15 }
 0x143   : > { %v2892_v24 = vpop.eup %2891 }
 0x144   : > { %v397_v26 = vmul.f32 %v2892_v24, %v389_v4  ;;  %v2454_v24 = vld [vmem:[%s3364_s7 + $0x20] sm:$0xff] }
 0x146   : > { %v405_v30 = vmul.f32 %v2432_v25, %v397_v26  ;;  %v2455_v25 = vld [vmem:[%s3364_s7 + $0x28] sm:$0xff] }
 0x147   : > { %v2833_v26 = vpack.c.bf16 %v2455_v25, %v2454_v24 }
 0x148   : > { %v3048_v32 = vadd.f32 %v2433_v29, %v405_v30  ;;  %v2836_v29 = vpack.c.bf16 %v2457_v28, %v2456_v27  ;;  %v2472_v30 = vld [vmem:[%s3360_s3 + $0x40] sm:$0xff] }
 0x14a   : > { %2619 = vmatmul.mubr.msk.f32.vlgmr.msra.gmra.mrb[0].mxu0 %vm383_vm0, %v3048_v32  ;;  %2630 = vmatmul.mubr.msk.f32.vlgmr.msra.gmra.mrb[0].mxu1 %vm383_vm0, %v3048_v32 }
 0x14b   : > { %2816 = vmatpush3.bf16.msra.mxu0 %v2815_v31  ;;  %2640 = vmatprep.mubr.msk.f32.mxu0 %vm2918_vm1, %v2919_v20  ;;  %v2473_v31 = vld [vmem:[%s3360_s3 + $0x48] sm:$0xff] }
 0x14c   : > { %2817 = vmatprep.subr.bf16.mxu0 %v2917_v12  ;;  %2645 = vmatprep.mubr.msk.f32.mxu1 %vm2918_vm1, %v2919_v20  ;;  %v2839_v33 = vpack.c.bf16 %v2473_v31, %v2472_v30 }
 0x14f   : > { %2819 = vmatpush3.bf16.msra.mxu0 %v2818_v35  ;;  %v2475_v35 = vld [vmem:[%s3360_s3 + $0x58] sm:$0xff] }
 0x150   : > { %2826 = vmatprep.subr.bf16.mxu0 %v2917_v12  ;;  %v2842_v36 = vpack.c.bf16 %v2475_v35, %v2474_v34 }
 0x152   : > { %2641 = vmatmul.mubr.msk.f32.vlgmr.msra.gmra.mrb[2].mxu0 %vm383_vm0, %v3048_v32 }
 0x153   : > { %2828 = vmatpush3.bf16.msra.mxu0 %v2827_v38  ;;  %2677 = vmatprep.mubr.msk.f32.mxu0 %vm2918_vm1, %v2919_v20  ;;  %v2481_v38 = vld [vmem:[%s3364_s7 + $0x48] sm:$0xff] }
 0x154   : > { %2829 = vmatprep.subr.bf16.mxu0 %v2917_v12  ;;  %v2851_v39 = vpack.c.bf16 %v2481_v38, %v2480_v37  ;;  %v2496_v38 = vld [vmem:[%s3366_s9 + $0x10] sm:$0xff] }
 0x157   : > { %2831 = vmatpush3.bf16.msra.mxu0 %v2830_v41  ;;  %v2483_v41 = vld [vmem:[%s3364_s7 + $0x58] sm:$0xff] }
 0x158   : > { %2691 = vmatprep.subr.mxu0 %v2919_v20 }
 0x15a   : > { %2678 = vmatmul.mubr.msk.f32.vlgmr.msra.gmra.mrb[4].mxu0 %vm383_vm0, %v3048_v32 }
 0x15b   : > { %2693 = vmatprep.mubr.msk.f32.mxu0 %vm2918_vm1, %v2919_v20 }
 0x21d   : > { %v518_v44 = vpop.f32.mrb[0].mxu0  ;;  %v596_v45 = vpop.f32.mrb[0].mxu1 }
 0x21e   : > { %v519_v46 = vadd.f32 %v2436_v42, %v518_v44  ;;  %v597_v47 = vadd.f32 %v2438_v43, %v596_v45  ;;  %v2620_v48 = vpop.f32.mrb[1].mxu0  ;;  %v2631_v49 = vpop.f32.mrb[1].mxu1  ;;  %v2854_v42 = vpack.c.bf16 %v2483_v41, %v2482_v40  ;;  %v2459_v45 = vld [vmem:[%s3361_s4 + $0x1] ss:$0 sm:$0xff]  ;;  %v2499_v41 = vld [vmem:[%s3360_s3 + $0x68] sm:$0xff] }
 0x21f   : > { %v2498_v40 = vld [vmem:[%s3360_s3 + $0x60] sm:$0xff] }
 0x220   : > { %v522_v50 = vmul.f32 0.35355338, %v519_v46  ;;  %2644 = vmatpush3.xpose.msk.msra.mxu1 %vm677_vm2, %v597_v47 }
 0x221   : > { %2648 = vmatprep.subr.mxu1 %v2919_v20 }
 0x223   : > { %2646 = vmatmul.mubr.msk.f32.vlgmr.msra.gmra.mrb[2].mxu1 %vm677_vm2, %v522_v50  ;;  %v2465_v50 = vld [vmem:[%s3365_s8 + $0x1] ss:$0 sm:$0xff] }
 0x224   : > { %2650 = vmatprep.mubr.msk.f32.mxu1 %vm2918_vm1, %v2919_v20 }
 0x225   : > { %v673_v52 = vpop.f32.mrb[2].mxu0 }
 0x226   : > { %v674_v53 = vadd.f32 %v2440_v51, %v673_v52  ;;  %v2642_v54 = vpop.f32.mrb[3].mxu0 }
 0x228   : > { %2649 = vmatpush3.msra.mxu1 %v674_v53 }
 0x229   : > { %2653 = vmatprep.subr.mxu1 %v2919_v20 }
 0x22d   : > { %v1081_v56 = vpop.f32.mrb[4].mxu0 }
 0x22e   : > { %v1082_v57 = vadd.f32 %v2462_v55, %v1081_v56  ;;  %v2679_v58 = vpop.f32.mrb[5].mxu0  ;;  %v2491_v56 = vld [vmem:[%s3365_s8 + $0x2] ss:$0 sm:$0xff] }
 0x230   : > { %2692 = vmatpush3.xpose.msk.msra.mxu0 %vm677_vm2, %v1082_v57 }
 0x231   : > { %2696 = vmatprep.subr.mxu0 %v2919_v20 }
 0x2f6   : > { %v750_v1 = vpop.f32.mrb[2].mxu1 }
 0x2f7   : > { %v751_v2 = vadd.f32 %v750_v1, %v3109_v63  ;;  %v2647_v3 = vpop.f32.mrb[3].mxu1 }
 0x2f9   : > { %v754_v4 = vsel %vm677_vm2, %v751_v2, -inf }
 0x2fa   : > { %755 = vmax.xlane.f32.xlu1 %v754_v4 }
 0x387   : > { %v756_v5 = vpop.xlane.xlu1 %755 }
 0x388   : > { %v757_v6 = vsub.f32 %v751_v2, %v756_v5 }
 0x38a   : > { %v758_v7 = vmul.f32 1.442695, %v757_v6 }
 0x38c   : > { %2893 = vpow2.f32 %v758_v7 }
 0x396   : > { %v2894_v8 = vpop.eup %2893 }
 0x397   : > { %v760_v9 = vsel %vm677_vm2, %v2894_v8, 0.0 }
 0x398   : > { %761 = vadd.xlane.f32.xlu1 %v760_v9 }
 0x425   : > { %v762_v10 = vpop.xlane.xlu1 %761 }
 0x426   : > { %2895 = vrcp.f32 %v762_v10  ;;  %v2470_v10 = vld [vmem:[%s3366_s9 + $0x8] sm:$0xff] }
 0x430   : > { %v2896_v11 = vpop.eup %2895 }
 0x431   : > { %v764_v13 = vmul.f32 %v2896_v11, %v2894_v8  ;;  %v2476_v11 = vld [vmem:[%s3362_s5 + $0x40] sm:$0xff] }
 0x433   : > { %2651 = vmatmul.mubr.msk.f32.vlgmr.msra.gmra.mrb[4].mxu1 %vm677_vm2, %v764_v13  ;;  %v2477_v13 = vld [vmem:[%s3362_s5 + $0x48] sm:$0xff] }
 0x434   : > { %2654 = vmatpush3.msra.mxu1 %v838_v14  ;;  %2655 = vmatprep.mubr.msk.f32.mxu1 %vm2918_vm1, %v2919_v20  ;;  %v2845_v14 = vpack.c.bf16 %v2477_v13, %v2476_v11 }
 0x435   : > { %2820 = vmatprep.subr.bf16.mxu1 %v2917_v12 }
 0x506   : > { %v834_v21 = vpop.f32.mrb[4].mxu1 }
 0x507   : > { %v2652_v22 = vpop.f32.mrb[5].mxu1  ;;  %2656 = vmatmul.mubr.msk.f32.vlgmr.msra.gmra.mrb[6].mxu1 %vm677_vm2, %v834_v21  ;;  %v2485_v21 = vld [vmem:[%s3361_s4 + $0x2] ss:$0 sm:$0xff] }
 0x508   : > { %2822 = vmatpush3.bf16.msra.mxu1 %v2821_v17  ;;  %2666 = vmatprep.mubr.msk.f32.mxu1 %vm2918_vm1, %v2919_v20  ;;  %v2488_v22 = vld [vmem:[%s3363_s6 + $0x2] ss:$0 sm:$0xff] }
 0x509   : > { %2823 = vmatprep.subr.bf16.mxu1 %v2917_v12 }
 0x50c   : > { %2825 = vmatpush3.bf16.msra.mxu1 %v2824_v23 }
 0x50d   : > { %2832 = vmatprep.subr.bf16.mxu1 %v2917_v12 }
 0x50f   : > { %2667 = vmatmul.mubr.msk.f32.vlgmr.msra.gmra.mrb[8].mxu1 %vm383_vm0, %v3048_v32 }
 0x510   : > { %2834 = vmatpush3.bf16.msra.mxu1 %v2833_v26  ;;  %2688 = vmatprep.mubr.msk.f32.mxu1 %vm2918_vm1, %v2919_v20 }
 0x511   : > { %2835 = vmatprep.subr.bf16.mxu1 %v2917_v12 }
 0x514   : > { %2837 = vmatpush3.bf16.msra.mxu1 %v2836_v29 }
 0x515   : > { %2838 = vmatprep.subr.bf16.mxu1 %v2917_v12 }
 0x517   : > { %2689 = vmatmul.mubr.msk.f32.vlgmr.msra.gmra.mrb[10].mxu1 %vm383_vm0, %v3048_v32 }
 0x518   : > { %2840 = vmatpush3.bf16.msra.mxu1 %v2839_v33  ;;  %2714 = vmatprep.mubr.msk.f32.mxu1 %vm2918_vm1, %v2919_v20 }
 0x519   : > { %2841 = vmatprep.subr.bf16.mxu1 %v2917_v12 }
 0x51c   : > { %2843 = vmatpush3.bf16.msra.mxu1 %v2842_v36 }
 0x51d   : > { %2850 = vmatprep.subr.bf16.mxu1 %v2917_v12 }
 0x51f   : > { %2715 = vmatmul.mubr.msk.f32.vlgmr.msra.gmra.mrb[12].mxu1 %vm383_vm0, %v3048_v32 }
 0x520   : > { %2852 = vmatpush3.bf16.msra.mxu1 %v2851_v39  ;;  %2736 = vmatprep.mubr.msk.f32.mxu1 %vm2918_vm1, %v2919_v20 }
 0x521   : > { %2853 = vmatprep.subr.bf16.mxu1 %v2917_v12 }
 0x524   : > { %2855 = vmatpush3.bf16.msra.mxu1 %v2854_v42 }
 0x525   : > { %2744 = vmatprep.subr.mxu1 %v2919_v20 }
 0x527   : > { %2737 = vmatmul.mubr.msk.f32.vlgmr.msra.gmra.mrb[14].mxu1 %vm383_vm0, %v3048_v32 }
 0x528   : > { %2746 = vmatprep.mubr.msk.f32.mxu1 %vm2918_vm1, %v2919_v20 }
 0x5da   : > { %v3196_v43 = vpop.f32.mrb[6].mxu1 }
 0x5db   : > { %v2657_v44 = vpop.f32.mrb[7].mxu1 }
 0x5dc   : > { %v2857_v44 = vpack.c.bf16 %v2499_v41, %v2498_v40 }
 0x5e2   : > { %v1002_v46 = vpop.f32.mrb[8].mxu1 }
 0x5e3   : > { %v1003_v47 = vadd.f32 %v2459_v45, %v1002_v46  ;;  %v2668_v48 = vpop.f32.mrb[9].mxu1  ;;  %v2500_v46 = vld [vmem:[%s3360_s3 + $0x70] sm:$0xff] }
 0x5e5   : > { %v1006_v49 = vmul.f32 0.35355338, %v1003_v47  ;;  %v2501_v47 = vld [vmem:[%s3360_s3 + $0x78] sm:$0xff] }
 0x5e6   : > { %v2860_v48 = vpack.c.bf16 %v2501_v47, %v2500_v46 }
 0x5e7   : > { %2694 = vmatmul.mubr.msk.f32.vlgmr.msra.gmra.mrb[6].mxu0 %vm677_vm2, %v1006_v49  ;;  %v2506_v49 = vld [vmem:[%s3364_s7 + $0x60] sm:$0xff] }
 0x5e8   : > { %2698 = vmatprep.mubr.msk.f32.mxu0 %vm2918_vm1, %v2919_v20 }
 0x5ea   : > { %v1159_v51 = vpop.f32.mrb[10].mxu1 }
 0x5eb   : > { %v1160_v52 = vadd.f32 %v2465_v50, %v1159_v51  ;;  %v2690_v53 = vpop.f32.mrb[11].mxu1  ;;  %v2507_v50 = vld [vmem:[%s3364_s7 + $0x68] sm:$0xff] }
 0x5ec   : > { %v2869_v51 = vpack.c.bf16 %v2507_v50, %v2506_v49  ;;  %v2509_v53 = vld [vmem:[%s3364_s7 + $0x78] sm:$0xff] }
 0x5ed   : > { %2697 = vmatpush3.msra.mxu0 %v1160_v52  ;;  %v2508_v52 = vld [vmem:[%s3364_s7 + $0x70] sm:$0xff] }
 0x5ee   : > { %2701 = vmatprep.subr.mxu0 %v2919_v20 }
 0x5f2   : > { %v1488_v54 = vpop.f32.mrb[12].mxu1 }
 0x5f3   : > { %v2716_v55 = vpop.f32.mrb[13].mxu1  ;;  %v1489_v23 = vadd.f32 %v2485_v21, %v1488_v54  ;;  %v2872_v54 = vpack.c.bf16 %v2509_v53, %v2508_v52 }
 0x5f4   : > { %v2502_v55 = vld [vmem:[%s3362_s5 + $0x60] sm:$0xff] }
 0x5f5   : > { %v1492_v27 = vmul.f32 0.35355338, %v1489_v23 }
 0x5fa   : > { %v1645_v57 = vpop.f32.mrb[14].mxu1 }
 0x5fb   : > { %v1646_v58 = vadd.f32 %v2491_v56, %v1645_v57  ;;  %v2738_v59 = vpop.f32.mrb[15].mxu1  ;;  %v2503_v56 = vld [vmem:[%s3362_s5 + $0x68] sm:$0xff] }
 0x5fc   : > { %v2863_v57 = vpack.c.bf16 %v2503_v56, %v2502_v55  ;;  %v2505_v59 = vld [vmem:[%s3362_s5 + $0x78] sm:$0xff] }
 0x5fd   : > { %2745 = vmatpush3.msra.mxu1 %v1646_v58  ;;  %v2504_v58 = vld [vmem:[%s3362_s5 + $0x70] sm:$0xff] }
 0x5fe   : > { %2856 = vmatprep.subr.bf16.mxu1 %v2917_v12 }
 0x6ba   : > { %v1235_v60 = vpop.f32.mrb[6].mxu0 }
 0x6bb   : > { %v1236_v61 = vadd.f32 %v1235_v60, %v3109_v63  ;;  %v2695_v62 = vpop.f32.mrb[7].mxu0 }
 0x6bc   : > { %v2866_v62 = vpack.c.bf16 %v2505_v59, %v2504_v58 }
 0x6bd   : > { %v1239_v1 = vsel %vm677_vm2, %v1236_v61, -inf }
 0x6be   : > { %1240 = vmax.xlane.f32.xlu0 %v1239_v1 }
 0x74b   : > { %v1241_v2 = vpop.xlane.xlu0 %1240 }
 0x74c   : > { %v1242_v3 = vsub.f32 %v1236_v61, %v1241_v2 }
 0x74e   : > { %v1243_v4 = vmul.f32 1.442695, %v1242_v3 }
 0x750   : > { %2897 = vpow2.f32 %v1243_v4 }
 0x75a   : > { %v2898_v5 = vpop.eup %2897 }
 0x75b   : > { %v1245_v6 = vsel %vm677_vm2, %v2898_v5, 0.0 }
 0x75c   : > { %1246 = vadd.xlane.f32.xlu1 %v1245_v6 }
 0x7e9   : > { %v1247_v7 = vpop.xlane.xlu1 %1246 }
 0x7ea   : > { %2899 = vrcp.f32 %v1247_v7 }
 0x7f4   : > { %v2900_v8 = vpop.eup %2899 }
 0x7f5   : > { %v1249_v9 = vmul.f32 %v2900_v8, %v2898_v5  ;;  %v2511_v5 = vld [vmem:[%s3361_s4 + $0x3] ss:$0 sm:$0xff] }
 0x7f7   : > { %2699 = vmatmul.mubr.msk.f32.vlgmr.msra.gmra.mrb[8].mxu0 %vm677_vm2, %v1249_v9 }
 0x7f8   : > { %2702 = vmatpush3.msra.mxu0 %v2470_v10  ;;  %2703 = vmatprep.mubr.msk.f32.mxu0 %vm2918_vm1, %v2919_v20 }
 0x7f9   : > { %2844 = vmatprep.subr.bf16.mxu0 %v2917_v12 }
 0x8ca   : > { %v1319_v17 = vpop.f32.mrb[8].mxu0 }
 0x8cb   : > { %v2700_v18 = vpop.f32.mrb[9].mxu0  ;;  %2704 = vmatmul.mubr.msk.f32.vlgmr.msra.gmra.mrb[10].mxu0 %vm677_vm2, %v1319_v17 }
 0x8cc   : > { %2846 = vmatpush3.bf16.msra.mxu0 %v2845_v14  ;;  %2725 = vmatprep.mubr.msk.f32.mxu0 %vm2918_vm1, %v2919_v20 }
 0x8cd   : > { %2847 = vmatprep.subr.bf16.mxu0 %v2917_v12 }
 0x8d0   : > { %2849 = vmatpush3.bf16.msra.mxu0 %v2848_v19 }
 0x8d1   : > { %2739 = vmatprep.subr.mxu0 %v2919_v20 }
 0x8d3   : > { %2726 = vmatmul.mubr.msk.f32.vlgmr.msra.gmra.mrb[12].mxu0 %vm383_vm0, %v3048_v32 }
 0x8d4   : > { %2741 = vmatprep.mubr.msk.f32.mxu0 %vm2918_vm1, %v2919_v20 }
 0x9a6   : > { %v1567_v24 = vpop.f32.mrb[12].mxu0 }
 0x9a7   : > { %v1568_v25 = vadd.f32 %v2488_v22, %v1567_v24  ;;  %v2727_v26 = vpop.f32.mrb[13].mxu0 }
 0x9a9   : > { %2740 = vmatpush3.xpose.msk.msra.mxu0 %vm677_vm2, %v1568_v25 }
 0x9aa   : > { %2749 = vmatprep.subr.mxu0 %v2919_v20 }
 0x9ac   : > { %2742 = vmatmul.mubr.msk.f32.vlgmr.msra.gmra.mrb[14].mxu0 %vm677_vm2, %v1492_v27 }
 0x9ad   : > { %2751 = vmatprep.mubr.msk.f32.mxu0 %vm2918_vm1, %v2919_v20  ;;  %2750 = vmatpush3.msra.mxu0 %v2496_v38 }
 0x9ae   : > { %2862 = vmatprep.subr.bf16.mxu0 %v2917_v12 }
 0xa7f   : > { %v1721_v28 = vpop.f32.mrb[14].mxu0 }
 0xa80   : > { %v1722_v29 = vadd.f32 %v1721_v28, %v3109_v63  ;;  %v2743_v30 = vpop.f32.mrb[15].mxu0  ;;  %v2435_v28 = vld [vmem:[%s3367_s10] ss:$0 sm:$0xff] }
 0xa82   : > { %v1725_v31 = vsel %vm677_vm2, %v1722_v29, -inf }
 0xa83   : > { %1726 = vmax.xlane.f32.xlu0 %v1725_v31 }
 0xb10   : > { %v1727_v33 = vpop.xlane.xlu0 %1726 }
 0xb11   : > { %v1728_v34 = vsub.f32 %v1722_v29, %v1727_v33  ;;  %v429_v29 = vadd.f32 %v2435_v28, %v2996_v0 }
 0xb13   : > { %v1729_v35 = vmul.f32 1.442695, %v1728_v34  ;;  %v912_v30 = vadd.f32 %v3196_v43, %v429_v29 }
 0xb15   : > { %2901 = vpow2.f32 %v1729_v35 }
 0xb1f   : > { %v2902_v36 = vpop.eup %2901 }
 0xb20   : > { %v1731_v37 = vsel %vm677_vm2, %v2902_v36, 0.0 }
 0xb21   : > { %1732 = vadd.xlane.f32.xlu1 %v1731_v37 }
 0xbae   : > { %v1733_v39 = vpop.xlane.xlu1 %1732 }
 0xbaf   : > { %2903 = vrcp.f32 %v1733_v39 }
 0xbb9   : > { %v2904_v42 = vpop.eup %2903 }
 0xbba   : > { %v1735_v45 = vmul.f32 %v2904_v42, %v2902_v36 }
 0xbbc   : > { %2747 = vmatmul.mubr.msk.f32.vlgmr.msra.gmra.mrb[16].mxu1 %vm677_vm2, %v1735_v45 }
 0xbbd   : > { %2858 = vmatpush3.bf16.msra.mxu1 %v2857_v44  ;;  %2762 = vmatprep.mubr.msk.f32.mxu1 %vm2918_vm1, %v2919_v20 }
 0xbbe   : > { %2859 = vmatprep.subr.bf16.mxu1 %v2917_v12 }
 0xbc1   : > { %2861 = vmatpush3.bf16.msra.mxu1 %v2860_v48 }
 0xbc2   : > { %2868 = vmatprep.subr.bf16.mxu1 %v2917_v12 }
 0xbc4   : > { %2763 = vmatmul.mubr.msk.f32.vlgmr.msra.gmra.mrb[18].mxu1 %vm383_vm0, %v3048_v32 }
 0xbc5   : > { %2870 = vmatpush3.bf16.msra.mxu1 %v2869_v51  ;;  %2784 = vmatprep.mubr.msk.f32.mxu1 %vm2918_vm1, %v2919_v20 }
 0xbc6   : > { %2871 = vmatprep.subr.bf16.mxu1 %v2917_v12 }
 0xbc9   : > { %2873 = vmatpush3.bf16.msra.mxu1 %v2872_v54 }
 0xbcc   : > { %2785 = vmatmul.mubr.msk.f32.vlgmr.msra.gmra.mrb[20].mxu1 %vm383_vm0, %v3048_v32 }
 0xc8f   : > { %v1805_v60 = vpop.f32.mrb[16].mxu1 }
 0xc90   : > { %v2748_v61 = vpop.f32.mrb[17].mxu1  ;;  %2752 = vmatmul.mubr.msk.f32.vlgmr.msra.gmra.mrb[10].mxu0 %vm677_vm2, %v1805_v60 }
 0xc91   : > { %2864 = vmatpush3.bf16.msra.mxu0 %v2863_v57  ;;  %2773 = vmatprep.mubr.msk.f32.mxu0 %vm2918_vm1, %v2919_v20 }
 0xc92   : > { %2865 = vmatprep.subr.bf16.mxu0 %v2917_v12  ;;  %v2514_v12 = vld [vmem:[%s3363_s6 + $0x3] ss:$0 sm:$0xff] }
 0xc95   : > { %2867 = vmatpush3.bf16.msra.mxu0 %v2866_v62 }
 0xc96   : > { %2787 = vmatprep.subr.mxu0 %v2919_v20 }
 0xc97   : > { %v1974_v1 = vpop.f32.mrb[18].mxu1 }
 0xc98   : > { %v2764_v2 = vpop.f32.mrb[19].mxu1  ;;  %2774 = vmatmul.mubr.msk.f32.vlgmr.msra.gmra.mrb[16].mxu0 %vm383_vm0, %v3048_v32  ;;  %v1975_v6 = vadd.f32 %v2511_v5, %v1974_v1  ;;  %v2517_v32 = vld [vmem:[%s3365_s8 + $0x3] ss:$0 sm:$0xff] }
 0xc99   : > { %2789 = vmatprep.mubr.msk.f32.mxu0 %vm2918_vm1, %v2919_v20 }
 0xc9a   : > { %v1978_v10 = vmul.f32 0.35355338, %v1975_v6 }
 0xc9f   : > { %v2131_v3 = vpop.f32.mrb[20].mxu1 }
 0xca0   : > { %v2786_v4 = vpop.f32.mrb[21].mxu1  ;;  %v2132_v11 = vadd.f32 %v2517_v32, %v2131_v3 }
 0xd6b   : > { %v2053_v7 = vpop.f32.mrb[16].mxu0 }
 0xd6c   : > { %v2054_v8 = vadd.f32 %v2514_v12, %v2053_v7  ;;  %v2775_v9 = vpop.f32.mrb[17].mxu0 }
 0xd6e   : > { %2788 = vmatpush3.xpose.msk.msra.mxu0 %vm677_vm2, %v2054_v8 }
 0xd6f   : > { %2792 = vmatprep.subr.mxu0 %v2919_v20 }
 0xd71   : > { %2790 = vmatmul.mubr.msk.f32.vlgmr.msra.gmra.mrb[18].mxu0 %vm677_vm2, %v1978_v10 }
 0xd72   : > { %2793 = vmatpush3.msra.mxu0 %v2132_v11  ;;  %2794 = vmatprep.mubr.msk.f32.mxu0 %vm2918_vm1, %v2919_v20 }
 0xd73   : > { %2797 = vmatprep.subr.mxu0 %v2919_v20 }
 0xe44   : > { %v2207_v13 = vpop.f32.mrb[18].mxu0 }
 0xe45   : > { %v2208_v14 = vadd.f32 %v2207_v13, %v3109_v63  ;;  %v2791_v15 = vpop.f32.mrb[19].mxu0  ;;  %v2522_v63 = vld [vmem:[%s3366_s9 + $0x18] sm:$0xff] }
 0xe47   : > { %v2211_v16 = vsel %vm677_vm2, %v2208_v14, -inf }
 0xe48   : > { %2212 = vmax.xlane.f32.xlu0 %v2211_v16 }
 0xed5   : > { %v2213_v17 = vpop.xlane.xlu0 %2212 }
 0xed6   : > { %v2214_v18 = vsub.f32 %v2208_v14, %v2213_v17 }
 0xed8   : > { %v2215_v19 = vmul.f32 1.442695, %v2214_v18 }
 0xeda   : > { %2905 = vpow2.f32 %v2215_v19 }
 0xee4   : > { %v2906_v21 = vpop.eup %2905 }
 0xee5   : > { %v2217_v22 = vsel %vm677_vm2, %v2906_v21, 0.0 }
 0xee6   : > { %2218 = vadd.xlane.f32.xlu1 %v2217_v22 }
 0xf73   : > { %v2219_v23 = vpop.xlane.xlu1 %2218 }
 0xf74   : > { %2907 = vrcp.f32 %v2219_v23 }
 0xf7e   : > { %v2908_v24 = vpop.eup %2907 }
 0xf7f   : > { %v2221_v25 = vmul.f32 %v2908_v24, %v2906_v21 }
 0xf81   : > { %2795 = vmatmul.mubr.msk.f32.vlgmr.msra.gmra.mrb[20].mxu0 %vm677_vm2, %v2221_v25 }
 0xf82   : > { %2798 = vmatpush3.msra.mxu0 %v2522_v63  ;;  %2799 = vmatprep.mubr.msk.f32.mxu0 %vm2918_vm1, %v2919_v20 }
0x1054   : > { %v2291_v26 = vpop.f32.mrb[20].mxu0 }
0x1055   : > { %v2796_v27 = vpop.f32.mrb[21].mxu0  ;;  %2800 = vmatmul.mubr.msk.f32.vlgmr.msra.gmra.mrb[10].mxu0 %vm677_vm2, %v2291_v26 }
0x1128   : > { %v2366_v31 = vpop.f32.mrb[10].mxu0 }
0x1129   : > { %v2875_v33 = vadd.f32 %v2366_v31, %v912_v30  ;;  %v2801_v20 = vpop.f32.mrb[11].mxu0 }
0x112b   : > { %2371 = vst.msk [vmem:[%s381_s12] sm:$0xff] %vm383_vm0, %v2875_v33 }
0x112c PF: > { %s21_s17 = sadd.s32 1, %s2915_s17  }
0x112d   : > { %p18_p4 = scmp.ge.s32.totalorder %s21_s17, 4  }
0x112f   :  { %20 = sbr.rel (!%p18_p4) target bundleno = 1 (0x1), region = 115 }

</bundles_post_ra>
